<compile_context>
chip_gen: v7x
topology: tpu7x:2x2x1
jax: 0.10.0
libtpu: 0.0.40
codegen_flags: <defaults>
</compile_context>

<pallas_src>
import jax
import jax.numpy as jnp
from jax.experimental import pallas as pl
from jax.experimental.pallas import tpu as pltpu


def _lstm_attn_kernel(word_ref, h0_ref, c0_ref, enc_ref,
                      wih4_ref, whh4_ref, bias4_ref,
                      wattn_ref, battn_ref,
                      wwhc_h_ref, wwhc_c_ref, bwhc_ref,
                      wws_ref, bws_ref,
                      out_ref):
    TB = word_ref.shape[0]
    B, H = h0_ref.shape
    T = TB // B
    V = bws_ref.shape[1]

    h = h0_ref[...]                                   # (B, H)
    c = c0_ref[...]                                   # (B, H)
    word = word_ref[...]                              # (T*B, E), timestep-major

    # ---- Hoisted input projection + bias, per gate (opts #1/#2/#3). ----------
    # gx[g] : (T*B, H) = word @ W_ih_g^T + (b_ih_g + b_hh_g), gate order [i,f,g,o].
    gx = [jnp.dot(word, wih4_ref[g], preferred_element_type=jnp.float32)
          + bias4_ref[g] for g in range(4)]
    whh = [whh4_ref[g] for g in range(4)]             # each (H, H)

    # ---- LSTM recurrence: only h @ W_hh_g + elementwise math on the serial path.
    # TODO(synk): switch to lax.fori_loop(..., unroll=True) if T becomes large.
    for t in range(T):
        r0 = t * B                                    # static row offset
        i_g = jax.nn.sigmoid(gx[0][r0:r0 + B] +
                             jnp.dot(h, whh[0], preferred_element_type=jnp.float32))
        f_g = jax.nn.sigmoid(gx[1][r0:r0 + B] +
                             jnp.dot(h, whh[1], preferred_element_type=jnp.float32))
        g_g = jnp.tanh(gx[2][r0:r0 + B] +
                       jnp.dot(h, whh[2], preferred_element_type=jnp.float32))
        o_g = jax.nn.sigmoid(gx[3][r0:r0 + B] +
                             jnp.dot(h, whh[3], preferred_element_type=jnp.float32))
        c = f_g * c + i_g * g_g
        h = o_g * jnp.tanh(c)

    # ---- Attention over the (flattened) encoder outputs. ---------------------
    enc = enc_ref[...]                                # (S, H)
    attn_h = (jnp.dot(h, wattn_ref[...], preferred_element_type=jnp.float32)
              + battn_ref[...])                       # (B, H)
    # attn_h @ enc.T without materializing the transpose.
    attn_prod = jax.lax.dot_general(attn_h, enc, (((1,), (1,)), ((), ())),
                                    preferred_element_type=jnp.float32)   # (B, S)
    m = jnp.max(attn_prod, axis=1, keepdims=True)
    e = jnp.exp(attn_prod - m)
    # Opt #4: softmax denominator via the EUP reciprocal slot.
    attn_w = e * pl.reciprocal(jnp.sum(e, axis=1, keepdims=True), approx=True)
    context = jnp.dot(attn_w, enc, preferred_element_type=jnp.float32)    # (B, H)

    # ---- Whc([h ; context]) via pre-split weight halves (no in-kernel concat).
    out_hc = jnp.tanh(
        jnp.dot(h, wwhc_h_ref[...], preferred_element_type=jnp.float32)
        + jnp.dot(context, wwhc_c_ref[...], preferred_element_type=jnp.float32)
        + bwhc_ref[...])                              # (B, H)

    # ---- Ws + numerically stable log-softmax. --------------------------------
    logits = (jnp.dot(out_hc, wws_ref[...], preferred_element_type=jnp.float32)
              + bws_ref[...])                         # (B, V)
    lmax = jnp.max(logits, axis=1, keepdims=True)
    lse = jnp.log(jnp.sum(jnp.exp(logits - lmax), axis=1, keepdims=True)) + lmax
    y = logits - lse

    # ---- Opt #5: single lane-dense output slab [ y | h_n | c_n | zero-pad ]. --
    pad = out_ref.shape[1] - (V + 2 * H)
    pieces = [y, h, c]
    if pad > 0:
        pieces.append(jnp.zeros((B, pad), jnp.float32))
    out_ref[...] = jnp.concatenate(pieces, axis=1)


def lstm_attn_classifier_forward(word, hidden, encoder_output, params):
    """Mirrors LSTMAttnClassifier.forward(word, hidden, encoder_output)."""
    h0, c0 = hidden                                   # each (1, B, H)
    B, T, E = word.shape
    H = h0.shape[-1]
    V = params["ws_w"].shape[0]
    enc = encoder_output.reshape(-1, H)               # (S, H)

    # Timestep-major layout so the hoisted input projection is indexed per step
    # with a cheap static row slice (no per-step middle-dim gather).
    word_tb = jnp.transpose(word, (1, 0, 2)).reshape(T * B, E)

    # Per-gate weight packing (PyTorch gate order [i, f, g, o]); weights are
    # pre-transposed to (in, out) so the kernel computes x @ W on the MXU.
    # NOTE: for larger H/E on v6e/v7x, casting these operands to bf16 (keeping
    # preferred_element_type=f32) is the intended scaling path.
    wih_T = params["lstm_w_ih"].T                     # (E, 4H)
    whh_T = params["lstm_w_hh"].T                     # (H, 4H)
    bias = (params["lstm_b_ih"] + params["lstm_b_hh"]).reshape(1, 4 * H)
    wih4 = jnp.stack([wih_T[:, g * H:(g + 1) * H] for g in range(4)])   # (4, E, H)
    whh4 = jnp.stack([whh_T[:, g * H:(g + 1) * H] for g in range(4)])   # (4, H, H)
    bias4 = jnp.stack([bias[:, g * H:(g + 1) * H] for g in range(4)])   # (4, 1, H)

    wattn_T = params["attn_w"].T                      # (H, H)
    battn = params["attn_b"].reshape(1, -1)
    whc_T = params["whc_w"].T                         # (2H, H)
    wwhc_h = whc_T[:H]                                # acts on hidden half
    wwhc_c = whc_T[H:]                                # acts on context half
    bwhc = params["whc_b"].reshape(1, -1)
    wws_T = params["ws_w"].T                          # (H, V)
    bws = params["ws_b"].reshape(1, -1)

    out_w = ((V + 2 * H + 127) // 128) * 128          # lane-dense output slab width

    inputs = (word_tb, h0[0], c0[0], enc,
              wih4, whh4, bias4,
              wattn_T, battn, wwhc_h, wwhc_c, bwhc, wws_T, bws)

    vmem = pl.BlockSpec(memory_space=pltpu.MemorySpace.VMEM)
    # Grid-less, all-resident-in-VMEM design: everything is a few hundred KB at
    # these shapes. A batch-parallel grid (dimension_semantics=("parallel",))
    # only pays off on v7x once B grows well beyond 2.
    slab = pl.pallas_call(
        _lstm_attn_kernel,
        out_shape=jax.ShapeDtypeStruct((B, out_w), jnp.float32),
        in_specs=[vmem] * len(inputs),
        out_specs=vmem,
    )(*inputs)

    y = slab[:, :V]
    hn = slab[:, V:V + H]
    cn = slab[:, V + H:V + 2 * H]
    # Module returns (y.unsqueeze(0), (h_n, c_n)) with h_n/c_n shaped (1, B, H).
    return y[None], (hn[None], cn[None])


def reference_forward(word, hidden, encoder_output, params):
    """Pure-JAX reference mirroring the PyTorch module exactly."""
    h, c = hidden[0][0], hidden[1][0]
    H = h.shape[-1]
    enc = encoder_output.reshape(-1, H)
    wih, whh = params["lstm_w_ih"], params["lstm_w_hh"]
    bih, bhh = params["lstm_b_ih"], params["lstm_b_hh"]
    for t in range(word.shape[1]):
        x = word[:, t, :]
        gates = x @ wih.T + bih + h @ whh.T + bhh
        i, f, g, o = jnp.split(gates, 4, axis=1)
        i, f, o = jax.nn.sigmoid(i), jax.nn.sigmoid(f), jax.nn.sigmoid(o)
        g = jnp.tanh(g)
        c = f * c + i * g
        h = o * jnp.tanh(c)
    attn_h = h @ params["attn_w"].T + params["attn_b"]
    attn_w = jax.nn.softmax(attn_h @ enc.T, axis=1)
    context = attn_w @ enc
    hc = jnp.concatenate([h, context], axis=1)
    out_hc = jnp.tanh(hc @ params["whc_w"].T + params["whc_b"])
    logits = out_hc @ params["ws_w"].T + params["ws_b"]
    return jax.nn.log_softmax(logits, axis=1)[None], (h[None], c[None])


def _xavier_uniform(key, shape):
    fan_out, fan_in = shape
    bound = (6.0 / (fan_in + fan_out)) ** 0.5
    return jax.random.uniform(key, shape, jnp.float32, -bound, bound)


if __name__ == "__main__":
    # Small shapes consistent with the module's forward:
    E, H, V = 16, 32, 16          # embedding_dim, hidden_dim, vocab_size
    B, T, S = 2, 4, 8             # batch, decoder seq len, encoder seq len

    key = jax.random.PRNGKey(0)
    ks = jax.random.split(key, 12)

    params = {
        "lstm_w_ih": _xavier_uniform(ks[0], (4 * H, E)),
        "lstm_w_hh": _xavier_uniform(ks[1], (4 * H, H)),
        "lstm_b_ih": jnp.zeros((4 * H,), jnp.float32),   # init_weight(): constant_(0)
        "lstm_b_hh": jnp.zeros((4 * H,), jnp.float32),
        "attn_w": _xavier_uniform(ks[2], (H, H)),
        "attn_b": jax.random.uniform(ks[3], (H,), jnp.float32, -0.1, 0.1),
        "whc_w": _xavier_uniform(ks[4], (H, 2 * H)),
        "whc_b": jax.random.uniform(ks[5], (H,), jnp.float32, -0.1, 0.1),
        "ws_w": _xavier_uniform(ks[6], (V, H)),
        "ws_b": jax.random.uniform(ks[7], (V,), jnp.float32, -0.1, 0.1),
    }
    # TODO(synk): `hidden2label` is defined in __init__ but unused in forward — omitted.

    word = jax.random.normal(ks[8], (B, T, E), jnp.float32)
    encoder_output = jax.random.normal(ks[9], (1, S, H), jnp.float32)
    h0 = jnp.zeros((1, B, H), jnp.float32)
    c0 = jnp.zeros((1, B, H), jnp.float32)

    y, (hn, cn) = lstm_attn_classifier_forward(word, (h0, c0), encoder_output, params)
    jax.block_until_ready((y, hn, cn))

    y_ref, (hn_ref, cn_ref) = reference_forward(word, (h0, c0), encoder_output, params)
    assert y.shape == (1, B, V) and hn.shape == (1, B, H) and cn.shape == (1, B, H)
    # y tolerance is loosened slightly because the attention softmax uses the
    # hardware approximate reciprocal (pl.reciprocal(approx=True)).
    assert jnp.allclose(y, y_ref, atol=2e-3), "log-softmax output mismatch"
    assert jnp.allclose(hn, hn_ref, atol=2e-5), "h_n mismatch"
    assert jnp.allclose(cn, cn_ref, atol=2e-5), "c_n mismatch"

    print("KERNEL_OK")
</pallas_src>

<mosaic_0001>
module attributes {stable_mosaic.version = 11 : i64} {
  func.func @_lstm_attn_kernel(%arg0: memref<8x16xf32, #tpu.memory_space<vmem>>, %arg1: memref<2x32xf32, #tpu.memory_space<vmem>>, %arg2: memref<2x32xf32, #tpu.memory_space<vmem>>, %arg3: memref<8x32xf32, #tpu.memory_space<vmem>>, %arg4: memref<4x16x32xf32, #tpu.memory_space<vmem>>, %arg5: memref<4x32x32xf32, #tpu.memory_space<vmem>>, %arg6: memref<4x1x32xf32, #tpu.memory_space<vmem>>, %arg7: memref<32x32xf32, #tpu.memory_space<vmem>>, %arg8: memref<1x32xf32, #tpu.memory_space<vmem>>, %arg9: memref<32x32xf32, #tpu.memory_space<vmem>>, %arg10: memref<32x32xf32, #tpu.memory_space<vmem>>, %arg11: memref<1x32xf32, #tpu.memory_space<vmem>>, %arg12: memref<32x16xf32, #tpu.memory_space<vmem>>, %arg13: memref<1x16xf32, #tpu.memory_space<vmem>>, %arg14: memref<2x128xf32, #tpu.memory_space<vmem>>) attributes {dimension_semantics = [], scalar_prefetch = 0 : i64, scratch_operands = 0 : i64, tpu.core_type = #tpu.core_type<tc>} {
    %c0 = arith.constant 0 : index
    %c0_0 = arith.constant 0 : index
    %0 = vector.load %arg1[%c0, %c0_0] : memref<2x32xf32, #tpu.memory_space<vmem>>, vector<2x32xf32>
    %c0_1 = arith.constant 0 : index
    %c0_2 = arith.constant 0 : index
    %1 = vector.load %arg2[%c0_1, %c0_2] : memref<2x32xf32, #tpu.memory_space<vmem>>, vector<2x32xf32>
    %c0_3 = arith.constant 0 : index
    %c0_4 = arith.constant 0 : index
    %2 = vector.load %arg0[%c0_3, %c0_4] : memref<8x16xf32, #tpu.memory_space<vmem>>, vector<8x16xf32>
    %c0_5 = arith.constant 0 : index
    %c0_6 = arith.constant 0 : index
    %c0_7 = arith.constant 0 : index
    %3 = vector.load %arg4[%c0_5, %c0_6, %c0_7] : memref<4x16x32xf32, #tpu.memory_space<vmem>>, vector<1x16x32xf32>
    %4 = vector.shape_cast %3 : vector<1x16x32xf32> to vector<16x32xf32>
    %cst = arith.constant dense<0.000000e+00> : vector<8x32xf32>
    %5 = tpu.matmul %2, %4, %cst {dimension_numbers = #tpu.dot_dimension_numbers<[1], [0], [0], [1], [0, 0, 1, 1], [], []>} : vector<8x16xf32>, vector<16x32xf32>, vector<8x32xf32> -> vector<8x32xf32>
    %c0_8 = arith.constant 0 : index
    %c0_9 = arith.constant 0 : index
    %c0_10 = arith.constant 0 : index
    %6 = vector.load %arg6[%c0_8, %c0_9, %c0_10] : memref<4x1x32xf32, #tpu.memory_space<vmem>>, vector<1x1x32xf32>
    %7 = vector.shape_cast %6 : vector<1x1x32xf32> to vector<1x32xf32>
    %8 = vector.broadcast %7 : vector<1x32xf32> to vector<8x32xf32>
    %9 = arith.addf %5, %8 : vector<8x32xf32>
    %c1 = arith.constant 1 : index
    %c0_11 = arith.constant 0 : index
    %c0_12 = arith.constant 0 : index
    %10 = vector.load %arg4[%c1, %c0_11, %c0_12] : memref<4x16x32xf32, #tpu.memory_space<vmem>>, vector<1x16x32xf32>
    %11 = vector.shape_cast %10 : vector<1x16x32xf32> to vector<16x32xf32>
    %cst_13 = arith.constant dense<0.000000e+00> : vector<8x32xf32>
    %12 = tpu.matmul %2, %11, %cst_13 {dimension_numbers = #tpu.dot_dimension_numbers<[1], [0], [0], [1], [0, 0, 1, 1], [], []>} : vector<8x16xf32>, vector<16x32xf32>, vector<8x32xf32> -> vector<8x32xf32>
    %c1_14 = arith.constant 1 : index
    %c0_15 = arith.constant 0 : index
    %c0_16 = arith.constant 0 : index
    %13 = vector.load %arg6[%c1_14, %c0_15, %c0_16] : memref<4x1x32xf32, #tpu.memory_space<vmem>>, vector<1x1x32xf32>
    %14 = vector.shape_cast %13 : vector<1x1x32xf32> to vector<1x32xf32>
    %15 = vector.broadcast %14 : vector<1x32xf32> to vector<8x32xf32>
    %16 = arith.addf %12, %15 : vector<8x32xf32>
    %c2 = arith.constant 2 : index
    %c0_17 = arith.constant 0 : index
    %c0_18 = arith.constant 0 : index
    %17 = vector.load %arg4[%c2, %c0_17, %c0_18] : memref<4x16x32xf32, #tpu.memory_space<vmem>>, vector<1x16x32xf32>
    %18 = vector.shape_cast %17 : vector<1x16x32xf32> to vector<16x32xf32>
    %cst_19 = arith.constant dense<0.000000e+00> : vector<8x32xf32>
    %19 = tpu.matmul %2, %18, %cst_19 {dimension_numbers = #tpu.dot_dimension_numbers<[1], [0], [0], [1], [0, 0, 1, 1], [], []>} : vector<8x16xf32>, vector<16x32xf32>, vector<8x32xf32> -> vector<8x32xf32>
    %c2_20 = arith.constant 2 : index
    %c0_21 = arith.constant 0 : index
    %c0_22 = arith.constant 0 : index
    %20 = vector.load %arg6[%c2_20, %c0_21, %c0_22] : memref<4x1x32xf32, #tpu.memory_space<vmem>>, vector<1x1x32xf32>
    %21 = vector.shape_cast %20 : vector<1x1x32xf32> to vector<1x32xf32>
    %22 = vector.broadcast %21 : vector<1x32xf32> to vector<8x32xf32>
    %23 = arith.addf %19, %22 : vector<8x32xf32>
    %c3 = arith.constant 3 : index
    %c0_23 = arith.constant 0 : index
    %c0_24 = arith.constant 0 : index
    %24 = vector.load %arg4[%c3, %c0_23, %c0_24] : memref<4x16x32xf32, #tpu.memory_space<vmem>>, vector<1x16x32xf32>
    %25 = vector.shape_cast %24 : vector<1x16x32xf32> to vector<16x32xf32>
    %cst_25 = arith.constant dense<0.000000e+00> : vector<8x32xf32>
    %26 = tpu.matmul %2, %25, %cst_25 {dimension_numbers = #tpu.dot_dimension_numbers<[1], [0], [0], [1], [0, 0, 1, 1], [], []>} : vector<8x16xf32>, vector<16x32xf32>, vector<8x32xf32> -> vector<8x32xf32>
    %c3_26 = arith.constant 3 : index
    %c0_27 = arith.constant 0 : index
    %c0_28 = arith.constant 0 : index
    %27 = vector.load %arg6[%c3_26, %c0_27, %c0_28] : memref<4x1x32xf32, #tpu.memory_space<vmem>>, vector<1x1x32xf32>
    %28 = vector.shape_cast %27 : vector<1x1x32xf32> to vector<1x32xf32>
    %29 = vector.broadcast %28 : vector<1x32xf32> to vector<8x32xf32>
    %30 = arith.addf %26, %29 : vector<8x32xf32>
    %c0_29 = arith.constant 0 : index
    %c0_30 = arith.constant 0 : index
    %c0_31 = arith.constant 0 : index
    %31 = vector.load %arg5[%c0_29, %c0_30, %c0_31] : memref<4x32x32xf32, #tpu.memory_space<vmem>>, vector<1x32x32xf32>
    %32 = vector.shape_cast %31 : vector<1x32x32xf32> to vector<32x32xf32>
    %c1_32 = arith.constant 1 : index
    %c0_33 = arith.constant 0 : index
    %c0_34 = arith.constant 0 : index
    %33 = vector.load %arg5[%c1_32, %c0_33, %c0_34] : memref<4x32x32xf32, #tpu.memory_space<vmem>>, vector<1x32x32xf32>
    %34 = vector.shape_cast %33 : vector<1x32x32xf32> to vector<32x32xf32>
    %c2_35 = arith.constant 2 : index
    %c0_36 = arith.constant 0 : index
    %c0_37 = arith.constant 0 : index
    %35 = vector.load %arg5[%c2_35, %c0_36, %c0_37] : memref<4x32x32xf32, #tpu.memory_space<vmem>>, vector<1x32x32xf32>
    %36 = vector.shape_cast %35 : vector<1x32x32xf32> to vector<32x32xf32>
    %c3_38 = arith.constant 3 : index
    %c0_39 = arith.constant 0 : index
    %c0_40 = arith.constant 0 : index
    %37 = vector.load %arg5[%c3_38, %c0_39, %c0_40] : memref<4x32x32xf32, #tpu.memory_space<vmem>>, vector<1x32x32xf32>
    %38 = vector.shape_cast %37 : vector<1x32x32xf32> to vector<32x32xf32>
    %39 = vector.extract_strided_slice %9 {offsets = [0, 0], sizes = [2, 32], strides = [1, 1]} : vector<8x32xf32> to vector<2x32xf32>
    %cst_41 = arith.constant dense<0.000000e+00> : vector<2x32xf32>
    %40 = tpu.matmul %0, %32, %cst_41 {dimension_numbers = #tpu.dot_dimension_numbers<[1], [0], [0], [1], [0, 0, 1, 1], [], []>} : vector<2x32xf32>, vector<32x32xf32>, vector<2x32xf32> -> vector<2x32xf32>
    %41 = arith.addf %39, %40 : vector<2x32xf32>
    %42 = arith.negf %41 : vector<2x32xf32>
    %43 = math.exp %42 : vector<2x32xf32>
    %cst_42 = arith.constant 1.000000e+00 : f32
    %44 = vector.broadcast %cst_42 : f32 to vector<2x32xf32>
    %45 = arith.addf %44, %43 : vector<2x32xf32>
    %46 = arith.divf %44, %45 : vector<2x32xf32>
    %47 = vector.extract_strided_slice %16 {offsets = [0, 0], sizes = [2, 32], strides = [1, 1]} : vector<8x32xf32> to vector<2x32xf32>
    %cst_43 = arith.constant dense<0.000000e+00> : vector<2x32xf32>
    %48 = tpu.matmul %0, %34, %cst_43 {dimension_numbers = #tpu.dot_dimension_numbers<[1], [0], [0], [1], [0, 0, 1, 1], [], []>} : vector<2x32xf32>, vector<32x32xf32>, vector<2x32xf32> -> vector<2x32xf32>
    %49 = arith.addf %47, %48 : vector<2x32xf32>
    %50 = arith.negf %49 : vector<2x32xf32>
    %51 = math.exp %50 : vector<2x32xf32>
    %cst_44 = arith.constant 1.000000e+00 : f32
    %52 = vector.broadcast %cst_44 : f32 to vector<2x32xf32>
    %53 = arith.addf %52, %51 : vector<2x32xf32>
    %54 = arith.divf %52, %53 : vector<2x32xf32>
    %55 = vector.extract_strided_slice %23 {offsets = [0, 0], sizes = [2, 32], strides = [1, 1]} : vector<8x32xf32> to vector<2x32xf32>
    %cst_45 = arith.constant dense<0.000000e+00> : vector<2x32xf32>
    %56 = tpu.matmul %0, %36, %cst_45 {dimension_numbers = #tpu.dot_dimension_numbers<[1], [0], [0], [1], [0, 0, 1, 1], [], []>} : vector<2x32xf32>, vector<32x32xf32>, vector<2x32xf32> -> vector<2x32xf32>
    %57 = arith.addf %55, %56 : vector<2x32xf32>
    %58 = math.tanh %57 : vector<2x32xf32>
    %59 = vector.extract_strided_slice %30 {offsets = [0, 0], sizes = [2, 32], strides = [1, 1]} : vector<8x32xf32> to vector<2x32xf32>
    %cst_46 = arith.constant dense<0.000000e+00> : vector<2x32xf32>
    %60 = tpu.matmul %0, %38, %cst_46 {dimension_numbers = #tpu.dot_dimension_numbers<[1], [0], [0], [1], [0, 0, 1, 1], [], []>} : vector<2x32xf32>, vector<32x32xf32>, vector<2x32xf32> -> vector<2x32xf32>
    %61 = arith.addf %59, %60 : vector<2x32xf32>
    %62 = arith.negf %61 : vector<2x32xf32>
    %63 = math.exp %62 : vector<2x32xf32>
    %cst_47 = arith.constant 1.000000e+00 : f32
    %64 = vector.broadcast %cst_47 : f32 to vector<2x32xf32>
    %65 = arith.addf %64, %63 : vector<2x32xf32>
    %66 = arith.divf %64, %65 : vector<2x32xf32>
    %67 = arith.mulf %54, %1 : vector<2x32xf32>
    %68 = arith.mulf %46, %58 : vector<2x32xf32>
    %69 = arith.addf %67, %68 : vector<2x32xf32>
    %70 = math.tanh %69 : vector<2x32xf32>
    %71 = arith.mulf %66, %70 : vector<2x32xf32>
    %72 = vector.extract_strided_slice %9 {offsets = [2, 0], sizes = [2, 32], strides = [1, 1]} : vector<8x32xf32> to vector<2x32xf32>
    %cst_48 = arith.constant dense<0.000000e+00> : vector<2x32xf32>
    %73 = tpu.matmul %71, %32, %cst_48 {dimension_numbers = #tpu.dot_dimension_numbers<[1], [0], [0], [1], [0, 0, 1, 1], [], []>} : vector<2x32xf32>, vector<32x32xf32>, vector<2x32xf32> -> vector<2x32xf32>
    %74 = arith.addf %72, %73 : vector<2x32xf32>
    %75 = arith.negf %74 : vector<2x32xf32>
    %76 = math.exp %75 : vector<2x32xf32>
    %cst_49 = arith.constant 1.000000e+00 : f32
    %77 = vector.broadcast %cst_49 : f32 to vector<2x32xf32>
    %78 = arith.addf %77, %76 : vector<2x32xf32>
    %79 = arith.divf %77, %78 : vector<2x32xf32>
    %80 = vector.extract_strided_slice %16 {offsets = [2, 0], sizes = [2, 32], strides = [1, 1]} : vector<8x32xf32> to vector<2x32xf32>
    %cst_50 = arith.constant dense<0.000000e+00> : vector<2x32xf32>
    %81 = tpu.matmul %71, %34, %cst_50 {dimension_numbers = #tpu.dot_dimension_numbers<[1], [0], [0], [1], [0, 0, 1, 1], [], []>} : vector<2x32xf32>, vector<32x32xf32>, vector<2x32xf32> -> vector<2x32xf32>
    %82 = arith.addf %80, %81 : vector<2x32xf32>
    %83 = arith.negf %82 : vector<2x32xf32>
    %84 = math.exp %83 : vector<2x32xf32>
    %cst_51 = arith.constant 1.000000e+00 : f32
    %85 = vector.broadcast %cst_51 : f32 to vector<2x32xf32>
    %86 = arith.addf %85, %84 : vector<2x32xf32>
    %87 = arith.divf %85, %86 : vector<2x32xf32>
    %88 = vector.extract_strided_slice %23 {offsets = [2, 0], sizes = [2, 32], strides = [1, 1]} : vector<8x32xf32> to vector<2x32xf32>
    %cst_52 = arith.constant dense<0.000000e+00> : vector<2x32xf32>
    %89 = tpu.matmul %71, %36, %cst_52 {dimension_numbers = #tpu.dot_dimension_numbers<[1], [0], [0], [1], [0, 0, 1, 1], [], []>} : vector<2x32xf32>, vector<32x32xf32>, vector<2x32xf32> -> vector<2x32xf32>
    %90 = arith.addf %88, %89 : vector<2x32xf32>
    %91 = math.tanh %90 : vector<2x32xf32>
    %92 = vector.extract_strided_slice %30 {offsets = [2, 0], sizes = [2, 32], strides = [1, 1]} : vector<8x32xf32> to vector<2x32xf32>
    %cst_53 = arith.constant dense<0.000000e+00> : vector<2x32xf32>
    %93 = tpu.matmul %71, %38, %cst_53 {dimension_numbers = #tpu.dot_dimension_numbers<[1], [0], [0], [1], [0, 0, 1, 1], [], []>} : vector<2x32xf32>, vector<32x32xf32>, vector<2x32xf32> -> vector<2x32xf32>
    %94 = arith.addf %92, %93 : vector<2x32xf32>
    %95 = arith.negf %94 : vector<2x32xf32>
    %96 = math.exp %95 : vector<2x32xf32>
    %cst_54 = arith.constant 1.000000e+00 : f32
    %97 = vector.broadcast %cst_54 : f32 to vector<2x32xf32>
    %98 = arith.addf %97, %96 : vector<2x32xf32>
    %99 = arith.divf %97, %98 : vector<2x32xf32>
    %100 = arith.mulf %87, %69 : vector<2x32xf32>
    %101 = arith.mulf %79, %91 : vector<2x32xf32>
    %102 = arith.addf %100, %101 : vector<2x32xf32>
    %103 = math.tanh %102 : vector<2x32xf32>
    %104 = arith.mulf %99, %103 : vector<2x32xf32>
    %105 = vector.extract_strided_slice %9 {offsets = [4, 0], sizes = [2, 32], strides = [1, 1]} : vector<8x32xf32> to vector<2x32xf32>
    %cst_55 = arith.constant dense<0.000000e+00> : vector<2x32xf32>
    %106 = tpu.matmul %104, %32, %cst_55 {dimension_numbers = #tpu.dot_dimension_numbers<[1], [0], [0], [1], [0, 0, 1, 1], [], []>} : vector<2x32xf32>, vector<32x32xf32>, vector<2x32xf32> -> vector<2x32xf32>
    %107 = arith.addf %105, %106 : vector<2x32xf32>
    %108 = arith.negf %107 : vector<2x32xf32>
    %109 = math.exp %108 : vector<2x32xf32>
    %cst_56 = arith.constant 1.000000e+00 : f32
    %110 = vector.broadcast %cst_56 : f32 to vector<2x32xf32>
    %111 = arith.addf %110, %109 : vector<2x32xf32>
    %112 = arith.divf %110, %111 : vector<2x32xf32>
    %113 = vector.extract_strided_slice %16 {offsets = [4, 0], sizes = [2, 32], strides = [1, 1]} : vector<8x32xf32> to vector<2x32xf32>
    %cst_57 = arith.constant dense<0.000000e+00> : vector<2x32xf32>
    %114 = tpu.matmul %104, %34, %cst_57 {dimension_numbers = #tpu.dot_dimension_numbers<[1], [0], [0], [1], [0, 0, 1, 1], [], []>} : vector<2x32xf32>, vector<32x32xf32>, vector<2x32xf32> -> vector<2x32xf32>
    %115 = arith.addf %113, %114 : vector<2x32xf32>
    %116 = arith.negf %115 : vector<2x32xf32>
    %117 = math.exp %116 : vector<2x32xf32>
    %cst_58 = arith.constant 1.000000e+00 : f32
    %118 = vector.broadcast %cst_58 : f32 to vector<2x32xf32>
    %119 = arith.addf %118, %117 : vector<2x32xf32>
    %120 = arith.divf %118, %119 : vector<2x32xf32>
    %121 = vector.extract_strided_slice %23 {offsets = [4, 0], sizes = [2, 32], strides = [1, 1]} : vector<8x32xf32> to vector<2x32xf32>
    %cst_59 = arith.constant dense<0.000000e+00> : vector<2x32xf32>
    %122 = tpu.matmul %104, %36, %cst_59 {dimension_numbers = #tpu.dot_dimension_numbers<[1], [0], [0], [1], [0, 0, 1, 1], [], []>} : vector<2x32xf32>, vector<32x32xf32>, vector<2x32xf32> -> vector<2x32xf32>
    %123 = arith.addf %121, %122 : vector<2x32xf32>
    %124 = math.tanh %123 : vector<2x32xf32>
    %125 = vector.extract_strided_slice %30 {offsets = [4, 0], sizes = [2, 32], strides = [1, 1]} : vector<8x32xf32> to vector<2x32xf32>
    %cst_60 = arith.constant dense<0.000000e+00> : vector<2x32xf32>
    %126 = tpu.matmul %104, %38, %cst_60 {dimension_numbers = #tpu.dot_dimension_numbers<[1], [0], [0], [1], [0, 0, 1, 1], [], []>} : vector<2x32xf32>, vector<32x32xf32>, vector<2x32xf32> -> vector<2x32xf32>
    %127 = arith.addf %125, %126 : vector<2x32xf32>
    %128 = arith.negf %127 : vector<2x32xf32>
    %129 = math.exp %128 : vector<2x32xf32>
    %cst_61 = arith.constant 1.000000e+00 : f32
    %130 = vector.broadcast %cst_61 : f32 to vector<2x32xf32>
    %131 = arith.addf %130, %129 : vector<2x32xf32>
    %132 = arith.divf %130, %131 : vector<2x32xf32>
    %133 = arith.mulf %120, %102 : vector<2x32xf32>
    %134 = arith.mulf %112, %124 : vector<2x32xf32>
    %135 = arith.addf %133, %134 : vector<2x32xf32>
    %136 = math.tanh %135 : vector<2x32xf32>
    %137 = arith.mulf %132, %136 : vector<2x32xf32>
    %138 = vector.extract_strided_slice %9 {offsets = [6, 0], sizes = [2, 32], strides = [1, 1]} : vector<8x32xf32> to vector<2x32xf32>
    %cst_62 = arith.constant dense<0.000000e+00> : vector<2x32xf32>
    %139 = tpu.matmul %137, %32, %cst_62 {dimension_numbers = #tpu.dot_dimension_numbers<[1], [0], [0], [1], [0, 0, 1, 1], [], []>} : vector<2x32xf32>, vector<32x32xf32>, vector<2x32xf32> -> vector<2x32xf32>
    %140 = arith.addf %138, %139 : vector<2x32xf32>
    %141 = arith.negf %140 : vector<2x32xf32>
    %142 = math.exp %141 : vector<2x32xf32>
    %cst_63 = arith.constant 1.000000e+00 : f32
    %143 = vector.broadcast %cst_63 : f32 to vector<2x32xf32>
    %144 = arith.addf %143, %142 : vector<2x32xf32>
    %145 = arith.divf %143, %144 : vector<2x32xf32>
    %146 = vector.extract_strided_slice %16 {offsets = [6, 0], sizes = [2, 32], strides = [1, 1]} : vector<8x32xf32> to vector<2x32xf32>
    %cst_64 = arith.constant dense<0.000000e+00> : vector<2x32xf32>
    %147 = tpu.matmul %137, %34, %cst_64 {dimension_numbers = #tpu.dot_dimension_numbers<[1], [0], [0], [1], [0, 0, 1, 1], [], []>} : vector<2x32xf32>, vector<32x32xf32>, vector<2x32xf32> -> vector<2x32xf32>
    %148 = arith.addf %146, %147 : vector<2x32xf32>
    %149 = arith.negf %148 : vector<2x32xf32>
    %150 = math.exp %149 : vector<2x32xf32>
    %cst_65 = arith.constant 1.000000e+00 : f32
    %151 = vector.broadcast %cst_65 : f32 to vector<2x32xf32>
    %152 = arith.addf %151, %150 : vector<2x32xf32>
    %153 = arith.divf %151, %152 : vector<2x32xf32>
    %154 = vector.extract_strided_slice %23 {offsets = [6, 0], sizes = [2, 32], strides = [1, 1]} : vector<8x32xf32> to vector<2x32xf32>
    %cst_66 = arith.constant dense<0.000000e+00> : vector<2x32xf32>
    %155 = tpu.matmul %137, %36, %cst_66 {dimension_numbers = #tpu.dot_dimension_numbers<[1], [0], [0], [1], [0, 0, 1, 1], [], []>} : vector<2x32xf32>, vector<32x32xf32>, vector<2x32xf32> -> vector<2x32xf32>
    %156 = arith.addf %154, %155 : vector<2x32xf32>
    %157 = math.tanh %156 : vector<2x32xf32>
    %158 = vector.extract_strided_slice %30 {offsets = [6, 0], sizes = [2, 32], strides = [1, 1]} : vector<8x32xf32> to vector<2x32xf32>
    %cst_67 = arith.constant dense<0.000000e+00> : vector<2x32xf32>
    %159 = tpu.matmul %137, %38, %cst_67 {dimension_numbers = #tpu.dot_dimension_numbers<[1], [0], [0], [1], [0, 0, 1, 1], [], []>} : vector<2x32xf32>, vector<32x32xf32>, vector<2x32xf32> -> vector<2x32xf32>
    %160 = arith.addf %158, %159 : vector<2x32xf32>
    %161 = arith.negf %160 : vector<2x32xf32>
    %162 = math.exp %161 : vector<2x32xf32>
    %cst_68 = arith.constant 1.000000e+00 : f32
    %163 = vector.broadcast %cst_68 : f32 to vector<2x32xf32>
    %164 = arith.addf %163, %162 : vector<2x32xf32>
    %165 = arith.divf %163, %164 : vector<2x32xf32>
    %166 = arith.mulf %153, %135 : vector<2x32xf32>
    %167 = arith.mulf %145, %157 : vector<2x32xf32>
    %168 = arith.addf %166, %167 : vector<2x32xf32>
    %169 = math.tanh %168 : vector<2x32xf32>
    %170 = arith.mulf %165, %169 : vector<2x32xf32>
    %c0_69 = arith.constant 0 : index
    %c0_70 = arith.constant 0 : index
    %171 = vector.load %arg3[%c0_69, %c0_70] : memref<8x32xf32, #tpu.memory_space<vmem>>, vector<8x32xf32>
    %c0_71 = arith.constant 0 : index
    %c0_72 = arith.constant 0 : index
    %172 = vector.load %arg7[%c0_71, %c0_72] : memref<32x32xf32, #tpu.memory_space<vmem>>, vector<32x32xf32>
    %cst_73 = arith.constant dense<0.000000e+00> : vector<2x32xf32>
    %173 = tpu.matmul %170, %172, %cst_73 {dimension_numbers = #tpu.dot_dimension_numbers<[1], [0], [0], [1], [0, 0, 1, 1], [], []>} : vector<2x32xf32>, vector<32x32xf32>, vector<2x32xf32> -> vector<2x32xf32>
    %c0_74 = arith.constant 0 : index
    %c0_75 = arith.constant 0 : index
    %174 = vector.load %arg8[%c0_74, %c0_75] : memref<1x32xf32, #tpu.memory_space<vmem>>, vector<1x32xf32>
    %175 = vector.broadcast %174 : vector<1x32xf32> to vector<2x32xf32>
    %176 = arith.addf %173, %175 : vector<2x32xf32>
    %cst_76 = arith.constant dense<0.000000e+00> : vector<2x8xf32>
    %177 = tpu.matmul %176, %171, %cst_76 {dimension_numbers = #tpu.dot_dimension_numbers<[1], [1], [0], [0], [0, 0, 1, 0], [], []>} : vector<2x32xf32>, vector<8x32xf32>, vector<2x8xf32> -> vector<2x8xf32>
    %cst_77 = arith.constant dense<0xFF800000> : vector<2xf32>
    %178 = vector.multi_reduction <maximumf>, %177, %cst_77 [1] : vector<2x8xf32> to vector<2xf32>
    %179 = vector.shape_cast %178 : vector<2xf32> to vector<2x1xf32>
    %180 = vector.broadcast %179 : vector<2x1xf32> to vector<2x8xf32>
    %181 = arith.subf %177, %180 : vector<2x8xf32>
    %182 = math.exp %181 : vector<2x8xf32>
    %cst_78 = arith.constant dense<0.000000e+00> : vector<2xf32>
    %183 = vector.multi_reduction <add>, %182, %cst_78 [1] : vector<2x8xf32> to vector<2xf32>
    %184 = vector.shape_cast %183 : vector<2xf32> to vector<2x1xf32>
    %185 = tpu.reciprocal %184 {approx = true} : vector<2x1xf32> -> vector<2x1xf32>
    %186 = vector.broadcast %185 : vector<2x1xf32> to vector<2x8xf32>
    %187 = arith.mulf %182, %186 : vector<2x8xf32>
    %cst_79 = arith.constant dense<0.000000e+00> : vector<2x32xf32>
    %188 = tpu.matmul %187, %171, %cst_79 {dimension_numbers = #tpu.dot_dimension_numbers<[1], [0], [0], [1], [0, 0, 1, 1], [], []>} : vector<2x8xf32>, vector<8x32xf32>, vector<2x32xf32> -> vector<2x32xf32>
    %c0_80 = arith.constant 0 : index
    %c0_81 = arith.constant 0 : index
    %189 = vector.load %arg9[%c0_80, %c0_81] : memref<32x32xf32, #tpu.memory_space<vmem>>, vector<32x32xf32>
    %cst_82 = arith.constant dense<0.000000e+00> : vector<2x32xf32>
    %190 = tpu.matmul %170, %189, %cst_82 {dimension_numbers = #tpu.dot_dimension_numbers<[1], [0], [0], [1], [0, 0, 1, 1], [], []>} : vector<2x32xf32>, vector<32x32xf32>, vector<2x32xf32> -> vector<2x32xf32>
    %c0_83 = arith.constant 0 : index
    %c0_84 = arith.constant 0 : index
    %191 = vector.load %arg10[%c0_83, %c0_84] : memref<32x32xf32, #tpu.memory_space<vmem>>, vector<32x32xf32>
    %cst_85 = arith.constant dense<0.000000e+00> : vector<2x32xf32>
    %192 = tpu.matmul %188, %191, %cst_85 {dimension_numbers = #tpu.dot_dimension_numbers<[1], [0], [0], [1], [0, 0, 1, 1], [], []>} : vector<2x32xf32>, vector<32x32xf32>, vector<2x32xf32> -> vector<2x32xf32>
    %193 = arith.addf %190, %192 : vector<2x32xf32>
    %c0_86 = arith.constant 0 : index
    %c0_87 = arith.constant 0 : index
    %194 = vector.load %arg11[%c0_86, %c0_87] : memref<1x32xf32, #tpu.memory_space<vmem>>, vector<1x32xf32>
    %195 = vector.broadcast %194 : vector<1x32xf32> to vector<2x32xf32>
    %196 = arith.addf %193, %195 : vector<2x32xf32>
    %197 = math.tanh %196 : vector<2x32xf32>
    %c0_88 = arith.constant 0 : index
    %c0_89 = arith.constant 0 : index
    %198 = vector.load %arg12[%c0_88, %c0_89] : memref<32x16xf32, #tpu.memory_space<vmem>>, vector<32x16xf32>
    %cst_90 = arith.constant dense<0.000000e+00> : vector<2x16xf32>
    %199 = tpu.matmul %197, %198, %cst_90 {dimension_numbers = #tpu.dot_dimension_numbers<[1], [0], [0], [1], [0, 0, 1, 1], [], []>} : vector<2x32xf32>, vector<32x16xf32>, vector<2x16xf32> -> vector<2x16xf32>
    %c0_91 = arith.constant 0 : index
    %c0_92 = arith.constant 0 : index
    %200 = vector.load %arg13[%c0_91, %c0_92] : memref<1x16xf32, #tpu.memory_space<vmem>>, vector<1x16xf32>
    %201 = vector.broadcast %200 : vector<1x16xf32> to vector<2x16xf32>
    %202 = arith.addf %199, %201 : vector<2x16xf32>
    %cst_93 = arith.constant dense<0xFF800000> : vector<2xf32>
    %203 = vector.multi_reduction <maximumf>, %202, %cst_93 [1] : vector<2x16xf32> to vector<2xf32>
    %204 = vector.shape_cast %203 : vector<2xf32> to vector<2x1xf32>
    %205 = vector.broadcast %204 : vector<2x1xf32> to vector<2x16xf32>
    %206 = arith.subf %202, %205 : vector<2x16xf32>
    %207 = math.exp %206 : vector<2x16xf32>
    %cst_94 = arith.constant dense<0.000000e+00> : vector<2xf32>
    %208 = vector.multi_reduction <add>, %207, %cst_94 [1] : vector<2x16xf32> to vector<2xf32>
    %209 = vector.shape_cast %208 : vector<2xf32> to vector<2x1xf32>
    %210 = math.log %209 : vector<2x1xf32>
    %211 = arith.addf %210, %204 : vector<2x1xf32>
    %212 = vector.broadcast %211 : vector<2x1xf32> to vector<2x16xf32>
    %213 = arith.subf %202, %212 : vector<2x16xf32>
    %cst_95 = arith.constant 0.000000e+00 : f32
    %214 = vector.broadcast %cst_95 : f32 to vector<2x48xf32>
    %215 = tpu.concatenate %213, %170, %168, %214 in 1 : vector<2x16xf32>, vector<2x32xf32>, vector<2x32xf32>, vector<2x48xf32> -> vector<2x128xf32>
    %c0_96 = arith.constant 0 : index
    %c0_97 = arith.constant 0 : index
    %216 = vector.load %arg14[%c0_96, %c0_97] : memref<2x128xf32, #tpu.memory_space<vmem>>, vector<2x128xf32>
    tpu.vector_store %arg14[%c0_96, %c0_97], %215 {strides = array<i32>} : memref<2x128xf32, #tpu.memory_space<vmem>>, vector<2x128xf32>,
    return
  }
}

</mosaic_0001>

<bundles_post_ra>
// kernel: tpu_custom_call.1
= control target key start
LH: loop header
LB: loop body
LE: loop exit
PB: predicated region body
PF: predicated region fallthrough
CT: control target
= control target key end

     0   :  { %19 = vsyncpa [#allocation3], 0  ;;  %s3658_s0 = inlined_call_operand.hbm [shape: f32[8,16], index: 0, kind: input, shape index: {}]   ;;  %s3659_s1 = inlined_call_operand.vmem [shape: f32[2,32], index: 1, kind: input, shape index: {}]   ;;  %s3660_s2 = inlined_call_operand.hbm [shape: f32[2,32], index: 2, kind: input, shape index: {}]   ;;  %s3661_s3 = inlined_call_operand.hbm [shape: f32[8,32], index: 3, kind: input, shape index: {}]   ;;  %s3662_s4 = inlined_call_operand.hbm [shape: f32[4,16,32], index: 4, kind: input, shape index: {}]   ;;  %s3663_s5 = inlined_call_operand.hbm [shape: f32[4,32,32], index: 5, kind: input, shape index: {}]   ;;  %s3664_s6 = inlined_call_operand.hbm [shape: f32[4,1,32], index: 6, kind: input, shape index: {}]   ;;  %s3665_s7 = inlined_call_operand.vmem [shape: f32[32,32], index: 7, kind: input, shape index: {}]   ;;  %s3666_s8 = inlined_call_operand.hbm [shape: f32[1,32], index: 8, kind: input, shape index: {}]   ;;  %s3667_s9 = inlined_call_operand.vmem [shape: f32[32,32], index: 9, kind: input, shape index: {}]   ;;  %s3668_s10 = inlined_call_operand.hbm [shape: f32[32,32], index: 10, kind: input, shape index: {}]   ;;  %s3669_s11 = inlined_call_operand.vmem [shape: f32[1,32], index: 11, kind: input, shape index: {}]   ;;  %s3670_s12 = inlined_call_operand.vmem [shape: f32[32,16], index: 12, kind: input, shape index: {}]   ;;  %s3671_s13 = inlined_call_operand.vmem [shape: f32[1,16], index: 13, kind: input, shape index: {}]   ;;  %s3672_s14 = inlined_call_operand.hbm [shape: f32[2,128], index: 14, kind: output, shape index: {}]  }
   0x1   :  { %20 = vsyncpa [#allocation6], 0 }
   0x2   :  { %21 = vsyncpa [#allocation9], 0 }
   0x3   :  { %22 = vsyncpa [#allocation12], 0 }
   0x4   :  { %23 = vsyncpa [#allocation15], 0 }
   0x5   :  { %24 = vsyncpa [#allocation4], 0  ;;  %s3181_s29 = smov [#allocation5]   ;;  %s3182_s15 = smov [#allocation8]  }
   0x6   :  { %s43_s30 = sshll.u32 %s3181_s29, 4  ;;  %s62_s16 = sshll.u32 %s3182_s15, 4  ;;  %s44_s30 = int_to_ptr.vmem [resolvable:$true] %s43_s30  ;;  %s3273_s16 = int_to_ptr.vmem [resolvable:$true] %s62_s16 }
   0x7   :  { %s2971_s19 = scalar_lea.hbm %s3660_s2, 32 }
   0x8   :  { %p2972_p0 = scmp.ne.s32.totalorder %s3660_s2, %s2971_s19  ;;  %p2975_p1 = scmp.lt.u32.totalorder %s2971_s19, %s3660_s2 }
   0xa   :  { %p2977_p2 = pnand %p2975_p1, %p2972_p0 }
   0xc   :  { %2980 = shalt.err (!%p2977_p2)
}
   0xd   :  { %s2981_s24 = scalar_lea.vmem %s44_s30, 32  ;;  %p2986_p4 = scmp.lt.s32.totalorder %s44_s30, %s44_s30 }
   0xe   :  { %p2982_p3 = scmp.ne.s32.totalorder %s44_s30, %s2981_s24  ;;  %p2987_p5 = scmp.lt.s32.totalorder %s2981_s24, %s2981_s24 }
  0x10   :  { %p2988_p6 = por %p2987_p5, %p2986_p4 }
  0x12   :  { %p2989_p7 = pnand %p2988_p6, %p2982_p3 }
  0x14   :  { %2992 = shalt.err (!%p2989_p7)
}
  0x15   :  { %46 = dma.hbm_to_vmem [thread:$0]  %s3660_s2, 32, %s44_s30, [#allocation6]  }
  0x16   :  { %s2993_s29 = scalar_lea.hbm %s3662_s4, 1024 }
  0x17   :  { %p2994_p8 = scmp.ne.s32.totalorder %s3662_s4, %s2993_s29  ;;  %p2997_p9 = scmp.lt.u32.totalorder %s2993_s29, %s3662_s4 }
  0x19   :  { %p2999_p10 = pnand %p2997_p9, %p2994_p8 }
  0x1b   :  { %3002 = shalt.err (!%p2999_p10)
}
  0x1c   :  { %s3003_s20 = scalar_lea.vmem %s3273_s16, 1024  ;;  %p3008_p12 = scmp.lt.s32.totalorder %s3273_s16, %s3273_s16 }
  0x1d   :  { %p3004_p11 = scmp.ne.s32.totalorder %s3273_s16, %s3003_s20  ;;  %p3009_p13 = scmp.lt.s32.totalorder %s3003_s20, %s3003_s20 }
  0x1f   :  { %p3010_p0 = por %p3009_p13, %p3008_p12 }
  0x21   :  { %p3011_p1 = pnand %p3010_p0, %p3004_p11 }
  0x23   :  { %3014 = shalt.err (!%p3011_p1)
}
  0x24   :  { %s3183_s2 = smov 128   ;;  %s3184_s30 = smov 8  }
  0x25   :  { %68 = dma.hbm_to_vmem [thread:$0]  %s3662_s4, 1024, %s3273_s16, [#allocation9], %s3183_s2, %s3183_s2, %s3184_s30  }
  0x26   :  { %s3185_s23 = smov [#allocation11]   ;;  %s3015_s27 = scalar_lea.hbm %s3664_s6, 64 }
  0x27   :  { %s86_s24 = sshll.u32 %s3185_s23, 4  ;;  %p3016_p2 = scmp.ne.s32.totalorder %s3664_s6, %s3015_s27  ;;  %s87_s24 = int_to_ptr.vmem [resolvable:$true] %s86_s24 }
  0x28   :  { %p3019_p3 = scmp.lt.u32.totalorder %s3015_s27, %s3664_s6 }
  0x2a   :  { %p3021_p4 = pnand %p3019_p3, %p3016_p2 }
  0x2c   :  { %3024 = shalt.err (!%p3021_p4)
}
  0x2d   :  { %s3025_s18 = scalar_lea.vmem %s87_s24, 64  ;;  %p3030_p6 = scmp.lt.s32.totalorder %s87_s24, %s87_s24 }
  0x2e   :  { %p3026_p5 = scmp.ne.s32.totalorder %s87_s24, %s3025_s18  ;;  %p3031_p7 = scmp.lt.s32.totalorder %s3025_s18, %s3025_s18 }
  0x30   :  { %p3032_p8 = por %p3031_p7, %p3030_p6 }
  0x32   :  { %p3033_p9 = pnand %p3032_p8, %p3026_p5 }
  0x34   :  { %3036 = shalt.err (!%p3033_p9)
}
  0x35   :  { %s3186_s4 = smov 16   ;;  %s3187_s16 = smov 1  }
  0x36   :  { %92 = dma.hbm_to_vmem [thread:$0]  %s3664_s6, 64, %s87_s24, [#allocation12], %s3186_s4, %s3186_s4, %s3187_s16  }
  0x37   :  { %s3188_s21 = smov [#allocation2]   ;;  %s3189_s23 = smov [#allocation7]  }
  0x38   :  { %s31_s22 = sshll.u32 %s3188_s21, 4  ;;  %s53_s25 = sshll.u32 %s3189_s23, 4  ;;  %s32_s22 = int_to_ptr.vmem [resolvable:$true] %s31_s22  ;;  %s54_s25 = int_to_ptr.vmem [resolvable:$true] %s53_s25 }
  0x39   :  { %s3037_s28 = scalar_lea.hbm %s3658_s0, 128 }
  0x3a   :  { %p3038_p10 = scmp.ne.s32.totalorder %s3658_s0, %s3037_s28  ;;  %p3041_p11 = scmp.lt.u32.totalorder %s3037_s28, %s3658_s0 }
  0x3c   :  { %p3043_p12 = pnand %p3041_p11, %p3038_p10 }
  0x3e   :  { %3046 = shalt.err (!%p3043_p12)
}
  0x3f   :  { %s3047_s6 = scalar_lea.vmem %s32_s22, 128  ;;  %p3052_p0 = scmp.lt.s32.totalorder %s32_s22, %s32_s22 }
  0x40   :  { %p3048_p13 = scmp.ne.s32.totalorder %s32_s22, %s3047_s6  ;;  %p3053_p1 = scmp.lt.s32.totalorder %s3047_s6, %s3047_s6 }
  0x42   :  { %p3054_p2 = por %p3053_p1, %p3052_p0 }
  0x44   :  { %p3055_p3 = pnand %p3054_p2, %p3048_p13 }
  0x46   :  { %3058 = shalt.err (!%p3055_p3)
}
  0x47   :  { %34 = dma.hbm_to_vmem [thread:$0]  %s3658_s0, 128, %s32_s22, [#allocation3]  }
  0x48   :  { %s3059_s21 = scalar_lea.hbm %s3661_s3, 128 }
  0x49   :  { %p3060_p4 = scmp.ne.s32.totalorder %s3661_s3, %s3059_s21  ;;  %p3063_p5 = scmp.lt.u32.totalorder %s3059_s21, %s3661_s3 }
  0x4b   :  { %p3065_p6 = pnand %p3063_p5, %p3060_p4 }
  0x4d   :  { %3068 = shalt.err (!%p3065_p6)
}
  0x4e   :  { %s3069_s29 = scalar_lea.vmem %s54_s25, 128  ;;  %p3074_p8 = scmp.lt.s32.totalorder %s54_s25, %s54_s25 }
  0x4f   :  { %p3070_p7 = scmp.ne.s32.totalorder %s54_s25, %s3069_s29  ;;  %p3075_p9 = scmp.lt.s32.totalorder %s3069_s29, %s3069_s29 }
  0x51   :  { %p3076_p10 = por %p3075_p9, %p3074_p8 }
  0x53   :  { %p3077_p11 = pnand %p3076_p10, %p3070_p7 }
  0x55   :  { %3080 = shalt.err (!%p3077_p11)
}
  0x56   :  { %56 = dma.hbm_to_vmem [thread:$0]  %s3661_s3, 128, %s54_s25, [#allocation6]  }
  0x57   :  { %s3190_s15 = smov [#allocation10]   ;;  %s3191_s18 = smov [#allocation13]  }
  0x58   :  { %s74_s17 = sshll.u32 %s3190_s15, 4  ;;  %s101_s6 = sshll.u32 %s3191_s18, 4  ;;  %s75_s17 = int_to_ptr.vmem [resolvable:$true] %s74_s17  ;;  %s102_s6 = int_to_ptr.vmem [resolvable:$true] %s101_s6 }
  0x59   :  { %s3081_s19 = scalar_lea.hbm %s3663_s5, 2048 }
  0x5a   :  { %p3082_p12 = scmp.ne.s32.totalorder %s3663_s5, %s3081_s19  ;;  %p3085_p13 = scmp.lt.u32.totalorder %s3081_s19, %s3663_s5 }
  0x5c   :  { %p3087_p0 = pnand %p3085_p13, %p3082_p12 }
  0x5e   :  { %3090 = shalt.err (!%p3087_p0)
}
  0x5f   :  { %s3091_s3 = scalar_lea.vmem %s75_s17, 2048  ;;  %p3096_p2 = scmp.lt.s32.totalorder %s75_s17, %s75_s17 }
  0x60   :  { %p3092_p1 = scmp.ne.s32.totalorder %s75_s17, %s3091_s3  ;;  %p3097_p3 = scmp.lt.s32.totalorder %s3091_s3, %s3091_s3 }
  0x62   :  { %p3098_p4 = por %p3097_p3, %p3096_p2 }
  0x64   :  { %p3099_p5 = pnand %p3098_p4, %p3092_p1 }
  0x66   :  { %3102 = shalt.err (!%p3099_p5)
}
  0x67   :  { %80 = dma.hbm_to_vmem [thread:$0]  %s3663_s5, 2048, %s75_s17, [#allocation9], %s3183_s2, %s3183_s2, %s3184_s30  }
  0x68   :  { %s3103_s0 = scalar_lea.hbm %s3666_s8, 16 }
  0x69   :  { %p3104_p6 = scmp.ne.s32.totalorder %s3666_s8, %s3103_s0  ;;  %p3107_p7 = scmp.lt.u32.totalorder %s3103_s0, %s3666_s8 }
  0x6b   :  { %p3109_p8 = pnand %p3107_p7, %p3104_p6 }
  0x6d   :  { %3112 = shalt.err (!%p3109_p8)
}
  0x6e   :  { %s3113_s16 = scalar_lea.vmem %s102_s6, 16  ;;  %s3117_s19 = scalar_lea.vmem %s102_s6, 32 }
  0x6f   :  { %p3114_p9 = scmp.ne.s32.totalorder %s102_s6, %s3113_s16  ;;  %p3118_p10 = scmp.lt.s32.totalorder %s102_s6, %s102_s6 }
  0x70   :  { %p3119_p11 = scmp.lt.s32.totalorder %s3117_s19, %s3113_s16 }
  0x72   :  { %p3120_p12 = por %p3119_p11, %p3118_p10 }
  0x74   :  { %p3121_p13 = pnand %p3120_p12, %p3114_p9 }
  0x76   :  { %3124 = shalt.err (!%p3121_p13)
}
  0x77   :  { %104 = dma.hbm_to_vmem [thread:$0]  %s3666_s8, 16, %s102_s6, [#allocation12]  }
  0x78   :  { %s3192_s20 = smov [#allocation14]   ;;  %s3125_s3 = scalar_lea.hbm %s3668_s10, 512 }
  0x79   :  { %s112_s21 = sshll.u32 %s3192_s20, 4  ;;  %p3126_p0 = scmp.ne.s32.totalorder %s3668_s10, %s3125_s3  ;;  %s113_s21 = int_to_ptr.vmem [resolvable:$true] %s112_s21 }
  0x7a   :  { %p3129_p1 = scmp.lt.u32.totalorder %s3125_s3, %s3668_s10 }
  0x7c   :  { %p3131_p2 = pnand %p3129_p1, %p3126_p0 }
  0x7e   :  { %3134 = shalt.err (!%p3131_p2)
}
  0x7f   :  { %s3135_s0 = scalar_lea.vmem %s113_s21, 512  ;;  %p3140_p4 = scmp.lt.s32.totalorder %s113_s21, %s113_s21 }
  0x80   :  { %p3136_p3 = scmp.ne.s32.totalorder %s113_s21, %s3135_s0  ;;  %p3141_p5 = scmp.lt.s32.totalorder %s3135_s0, %s3135_s0 }
  0x82   :  { %p3142_p6 = por %p3141_p5, %p3140_p4 }
  0x84   :  { %p3143_p7 = pnand %p3142_p6, %p3136_p3 }
  0x86   :  { %3146 = shalt.err (!%p3143_p7)
}
  0x87   :  { %118 = dma.hbm_to_vmem [thread:$0]  %s3668_s10, 512, %s113_s21, [#allocation15], %s3183_s2, %s3183_s2, %s3184_s30  }
  0x88   :  { %3169 = dma.done.wait [#allocation3], 128  }
  0x89   :  { %3170 = vsyncadd [#allocation3], 4294967168 }
  0x8a   :  { %3171 = dma.done.wait [#allocation6], 160  }
  0x8b   :  { %3172 = vsyncadd [#allocation6], 4294967136 }
  0x8c   :  { %3173 = dma.done.wait [#allocation9], 3072  }
  0x8d   :  { %3174 = vsyncadd [#allocation9], 4294964224 }
  0x8e   :  { %3175 = dma.done.wait [#allocation12], 80  }
  0x8f   :  { %3176 = vsyncadd [#allocation12], 4294967216 }
  0x90   :  { %3177 = dma.done.wait [#allocation15], 512  }
  0x91   :  { %3178 = vsyncadd [#allocation15], 4294966784  ;;  %v3193_v0 = vmov 0.0|0.0   ;;  %vm3194_vm0 = vmmov 0   ;;  %v3195_v1 = vmov 0.0   ;;  %v152_v2 = vld [vmem:[#allocation8] sm:$0xff] }
  0x92   :  { %2748 = vmatprep.subr.bf16.mxu1 %v3193_v0  ;;  %2754 = vmatprep.subr.bf16.mxu0 %v3193_v0  ;;  %v153_v3 = vld [vmem:[#allocation8 + $0x8] sm:$0xff]  ;;  %v317_v4 = vld [vmem:[#allocation8 + $0x20] sm:$0xff]  ;;  %v236_v7 = vld [vmem:[#allocation8 + $0x10] sm:$0xff]  ;;  %vm161_vm1 = vcmask 130048   ;;  %vm497_vm2 = vcmask 261120   ;;  %vm1951_vm3 = vcmask 58368  }
  0x93   :  { %2494 = vmatprep.mubr.msk.f32.mxu1 %vm3194_vm0, %v3195_v1  ;;  %2508 = vmatprep.mubr.msk.f32.mxu0 %vm3194_vm0, %v3195_v1  ;;  %v2749_v5 = vpack.c.bf16 %v153_v3, %v152_v2  ;;  %v318_v6 = vld [vmem:[#allocation8 + $0x28] sm:$0xff]  ;;  %v237_v9 = vld [vmem:[#allocation8 + $0x18] sm:$0xff]  ;;  %v478_v10 = vld [vmem:[#allocation10] sm:$0xff]  ;;  %vm1963_vm4 = vcmask 64512   ;;  %vm2281_vm5 = vcmask 123904   ;;  %vm2304_vm6 = vcmask 392192  }
  0x94   :  { %v2755_v8 = vpack.c.bf16 %v318_v6, %v317_v4  ;;  %v479_v11 = vld [vmem:[#allocation10 + $0x8] sm:$0xff]  ;;  %v2752_v13 = vpack.c.bf16 %v237_v9, %v236_v7  ;;  %v398_v15 = vld [vmem:[#allocation8 + $0x30] sm:$0xff]  ;;  %v399_v16 = vld [vmem:[#allocation8 + $0x38] sm:$0xff]  ;;  %vm2306_vm7 = vcmask 654336  }
  0x95   :  { %2750 = vmatpush3.bf16.msra.mxu1 %v2749_v5  ;;  %v151_v12 = vld [vmem:[#allocation2] sm:$0xff]  ;;  %v3394_v14 = vpack.c.bf16 %v479_v11, %v478_v10  ;;  %v481_v18 = vld [vmem:[#allocation10 + $0x18] sm:$0xff]  ;;  %v2758_v19 = vpack.c.bf16 %v399_v16, %v398_v15  ;;  %v483_v21 = vld [vmem:[#allocation10 + $0x20] sm:$0xff] }
  0x96   :  { %2756 = vmatpush3.bf16.msra.mxu0 %v2755_v8  ;;  %2751 = vmatprep.subr.bf16.mxu1 %v3193_v0  ;;  %v480_v17 = vld [vmem:[#allocation10 + $0x10] sm:$0xff]  ;;  %v484_v22 = vld [vmem:[#allocation10 + $0x28] sm:$0xff]  ;;  %v488_v23 = vld [vmem:[#allocation10 + $0x40] sm:$0xff] }
  0x97   :  { %2760 = vmatprep.subr.bf16.mxu0 %v3193_v0  ;;  %v3402_v20 = vpack.c.bf16 %v481_v18, %v480_v17  ;;  %v489_v24 = vld [vmem:[#allocation10 + $0x48] sm:$0xff]  ;;  %v3411_v25 = vpack.c.bf16 %v484_v22, %v483_v21  ;;  %v485_v28 = vld [vmem:[#allocation10 + $0x30] sm:$0xff]  ;;  %v486_v29 = vld [vmem:[#allocation10 + $0x38] sm:$0xff] }
  0x98   :  { %2495 = vmatmul.mubr.msk.f32.vlgmr.msra.gmra.mrb[0].mxu1 %vm161_vm1, %v151_v12  ;;  %v149_v26 = vld [vmem:[%s3659_s1] sm:$0x3]  ;;  %v3418_v27 = vpack.c.bf16 %v489_v24, %v488_v23  ;;  %v490_v30 = vld [vmem:[#allocation10 + $0x50] sm:$0xff]  ;;  %v491_v31 = vld [vmem:[#allocation10 + $0x58] sm:$0xff]  ;;  %v3424_v32 = vpack.c.bf16 %v486_v29, %v485_v28 }
  0x99   :  { %2753 = vmatpush3.bf16.msra.mxu1 %v2752_v13  ;;  %2509 = vmatmul.mubr.msk.f32.vlgmr.msra.gmra.mrb[0].mxu0 %vm161_vm1, %v151_v12  ;;  %v3428_v33 = vpack.c.bf16 %v491_v31, %v490_v30  ;;  %v493_v34 = vld [vmem:[#allocation10 + $0x60] sm:$0xff]  ;;  %v494_v35 = vld [vmem:[#allocation10 + $0x68] sm:$0xff]  ;;  %v495_v37 = vld [vmem:[#allocation10 + $0x70] sm:$0xff] }
  0x9a   :  { %2762 = vmatpush3.bf16.msra.mxu0 %v3394_v14  ;;  %2501 = vmatprep.mubr.msk.f32.mxu1 %vm3194_vm0, %v3195_v1  ;;  %v3436_v36 = vpack.c.bf16 %v494_v35, %v493_v34  ;;  %v496_v38 = vld [vmem:[#allocation10 + $0x78] sm:$0xff]  ;;  %v2328_v45 = vld [vmem:[#allocation11] ss:$0 sm:$0xff]  ;;  %v2330_v53 = vld [vmem:[#allocation11 + $0x1] ss:$0 sm:$0xff] }
  0x9b   :  { %2757 = vmatprep.subr.bf16.mxu1 %v3193_v0  ;;  %2763 = vmatprep.subr.bf16.mxu0 %v3193_v0  ;;  %v3444_v39 = vpack.c.bf16 %v496_v38, %v495_v37  ;;  %v2332_v57 = vld [vmem:[#allocation11 + $0x2] ss:$0 sm:$0xff]  ;;  %v2334_v2 = vld [vmem:[#allocation11 + $0x3] ss:$0 sm:$0xff]  ;;  %v150_v18 = vld [vmem:[#allocation5] sm:$0x3] }
  0x9c   :  { %2502 = vmatmul.mubr.msk.f32.vlgmr.msra.gmra.mrb[2].mxu1 %vm161_vm1, %v151_v12  ;;  %2526 = vmatprep.mubr.msk.f32.mxu0 %vm3194_vm0, %v3195_v1 }
  0x9d   :  { %2759 = vmatpush3.bf16.msra.mxu1 %v2758_v19  ;;  %2515 = vmatprep.mubr.msk.f32.mxu1 %vm3194_vm0, %v3195_v1 }
  0x9e   :  { %2765 = vmatpush3.bf16.msra.mxu0 %v3402_v20  ;;  %2766 = vmatprep.subr.bf16.mxu1 %v3193_v0 }
  0x9f   :  { %2772 = vmatprep.subr.bf16.mxu0 %v3193_v0 }
  0xa0   :  { %2516 = vmatmul.mubr.msk.f32.vlgmr.msra.gmra.mrb[4].mxu1 %vm161_vm1, %v151_v12 }
  0xa1   :  { %2527 = vmatmul.mubr.msk.f32.vlgmr.msra.gmra.mrb[2].mxu0 %vm497_vm2, %v149_v26  ;;  %2768 = vmatpush3.bf16.msra.mxu1 %v3411_v25 }
  0xa2   :  { %2774 = vmatpush3.bf16.msra.mxu0 %v3418_v27  ;;  %2769 = vmatprep.subr.bf16.mxu1 %v3193_v0 }
  0xa3   :  { %2775 = vmatprep.subr.bf16.mxu0 %v3193_v0  ;;  %2537 = vmatprep.mubr.msk.f32.mxu1 %vm3194_vm0, %v3195_v1 }
  0xa4   :  { %2548 = vmatprep.mubr.msk.f32.mxu0 %vm3194_vm0, %v3195_v1 }
  0xa5   :  { %2771 = vmatpush3.bf16.msra.mxu1 %v3424_v32 }
  0xa6   :  { %2777 = vmatpush3.bf16.msra.mxu0 %v3428_v33  ;;  %2778 = vmatprep.subr.bf16.mxu1 %v3193_v0 }
  0xa7   :  { %2784 = vmatprep.subr.bf16.mxu0 %v3193_v0 }
  0xa8   :  { %2538 = vmatmul.mubr.msk.f32.vlgmr.msra.gmra.mrb[6].mxu1 %vm497_vm2, %v149_v26 }
  0xa9   :  { %2549 = vmatmul.mubr.msk.f32.vlgmr.msra.gmra.mrb[4].mxu0 %vm497_vm2, %v149_v26  ;;  %2780 = vmatpush3.bf16.msra.mxu1 %v3436_v36 }
  0xaa   :  { %2781 = vmatprep.subr.bf16.mxu1 %v3193_v0  ;;  %2559 = vmatprep.mubr.msk.f32.mxu1 %vm3194_vm0, %v3195_v1 }
  0xab   :  { %2786 = vmatpush3.bf16.msra.mxu0 %v3394_v14  ;;  %2570 = vmatprep.mubr.msk.f32.mxu0 %vm3194_vm0, %v3195_v1 }
  0xac   :  { %2787 = vmatprep.subr.bf16.mxu0 %v3193_v0 }
  0xad   :  { %2783 = vmatpush3.bf16.msra.mxu1 %v3444_v39 }
  0xae   :  { %2790 = vmatprep.subr.bf16.mxu1 %v3193_v0 }
  0xaf   :  { %2789 = vmatpush3.bf16.msra.mxu0 %v3402_v20 }
  0xb0   :  { %2560 = vmatmul.mubr.msk.f32.vlgmr.msra.gmra.mrb[8].mxu1 %vm497_vm2, %v149_v26  ;;  %2796 = vmatprep.subr.bf16.mxu0 %v3193_v0 }
  0xb1   :  { %2792 = vmatpush3.bf16.msra.mxu1 %v3411_v25  ;;  %2581 = vmatprep.mubr.msk.f32.mxu1 %vm3194_vm0, %v3195_v1 }
  0xb2   :  { %2793 = vmatprep.subr.bf16.mxu1 %v3193_v0 }
  0xb5   :  { %2795 = vmatpush3.bf16.msra.mxu1 %v3424_v32 }
  0xb6   :  { %2802 = vmatprep.subr.bf16.mxu1 %v3193_v0 }
 0x16b   :  { %v231_v40 = vpop.f32.mrb[0].mxu1 }
 0x16c   :  { %v2496_v41 = vpop.f32.mrb[1].mxu1  ;;  %v393_v42 = vpop.f32.mrb[0].mxu0  ;;  %v3464_v47 = vadd.f32 %v2328_v45, %v231_v40 }
 0x16d   :  { %v2510_v43 = vpop.f32.mrb[1].mxu0  ;;  %v3470_v63 = vadd.f32 %v2332_v57, %v393_v42 }
 0x16f   :  { %v312_v44 = vpop.f32.mrb[2].mxu1 }
 0x170   :  { %v2503_v46 = vpop.f32.mrb[3].mxu1  ;;  %v3467_v55 = vadd.f32 %v2330_v53, %v312_v44 }
 0x173   :  { %v474_v48 = vpop.f32.mrb[4].mxu1 }
 0x174   :  { %v567_v49 = vpop.f32.mrb[2].mxu0  ;;  %v2517_v50 = vpop.f32.mrb[5].mxu1  ;;  %v3473_v4 = vadd.f32 %v2334_v2, %v474_v48 }
 0x175   :  { %v571_v51 = vadd.f32 %v567_v49, %v3464_v47  ;;  %v2528_v52 = vpop.f32.mrb[3].mxu0 }
 0x177   :  { %v2337_v54 = vmul.f32 -1.442695, %v571_v51 }
 0x179   :  { %2897 = vpow2.f32 %v2337_v54 }
 0x17b   :  { %v644_v56 = vpop.f32.mrb[6].mxu1 }
 0x17c   :  { %v648_v58 = vadd.f32 %v644_v56, %v3467_v55  ;;  %v721_v59 = vpop.f32.mrb[4].mxu0  ;;  %v2539_v60 = vpop.f32.mrb[7].mxu1 }
 0x17d   :  { %v2550_v61 = vpop.f32.mrb[5].mxu0  ;;  %v725_v3 = vadd.f32 %v721_v59, %v3470_v63 }
 0x17e   :  { %v2339_v62 = vmul.f32 -1.442695, %v648_v58 }
 0x180   :  { %2899 = vpow2.f32 %v2339_v62 }
 0x181   :  { %2901 = vtanh.f32 %v725_v3 }
 0x183   :  { %v2898_v5 = vpop.eup %2897  ;;  %v793_v6 = vpop.f32.mrb[8].mxu1 }
 0x184   :  { %v575_v7 = vadd.f32 1.0, %v2898_v5  ;;  %v797_v8 = vadd.f32 %v793_v6, %v3473_v4  ;;  %v2561_v9 = vpop.f32.mrb[9].mxu1 }
 0x186   :  { %2903 = vrcp.f32 %v575_v7  ;;  %v2342_v10 = vmul.f32 -1.442695, %v797_v8 }
 0x188   :  { %2905 = vpow2.f32 %v2342_v10 }
 0x18a   :  { %v2900_v11 = vpop.eup %2899 }
 0x18b   :  { %v652_v12 = vadd.f32 1.0, %v2900_v11  ;;  %v2902_v13 = vpop.eup %2901 }
 0x18d   :  { %2907 = vrcp.f32 %v652_v12 }
 0x190   :  { %v2904_v15 = vpop.eup %2903 }
 0x191   :  { %v805_v16 = vmul.f32 %v2904_v15, %v2902_v13 }
 0x192   :  { %v2906_v17 = vpop.eup %2905 }
 0x193   :  { %v801_v21 = vadd.f32 1.0, %v2906_v17 }
 0x195   :  { %2909 = vrcp.f32 %v801_v21 }
 0x197   :  { %v2908_v19 = vpop.eup %2907 }
 0x198   :  { %v804_v22 = vmul.f32 %v2908_v19, %v150_v18 }
 0x19a   :  { %v3476_v23 = vadd.f32 %v805_v16, %v804_v22 }
 0x19c   :  { %2911 = vtanh.f32 %v3476_v23  ;;  %v1128_v61 = vrot.slane %v3476_v23, 6 }
 0x19f   :  { %v2910_v24 = vpop.eup %2909 }
 0x1a6   :  { %v2912_v26 = vpop.eup %2911 }
 0x1a7   :  { %v808_v28 = vmul.f32 %v2912_v26, %v2910_v24 }
 0x1a9   :  { %2571 = vmatmul.mubr.msk.f32.vlgmr.msra.gmra.mrb[6].mxu0 %vm497_vm2, %v808_v28  ;;  %2582 = vmatmul.mubr.msk.f32.vlgmr.msra.gmra.mrb[10].mxu1 %vm497_vm2, %v808_v28 }
 0x1aa   :  { %2798 = vmatpush3.bf16.msra.mxu0 %v3418_v27  ;;  %2804 = vmatpush3.bf16.msra.mxu1 %v3436_v36 }
 0x1ab   :  { %2799 = vmatprep.subr.bf16.mxu0 %v3193_v0  ;;  %2805 = vmatprep.subr.bf16.mxu1 %v3193_v0 }
 0x1ac   :  { %2592 = vmatprep.mubr.msk.f32.mxu0 %vm3194_vm0, %v3195_v1  ;;  %2603 = vmatprep.mubr.msk.f32.mxu1 %vm3194_vm0, %v3195_v1 }
 0x1ae   :  { %2801 = vmatpush3.bf16.msra.mxu0 %v3428_v33  ;;  %2807 = vmatpush3.bf16.msra.mxu1 %v3444_v39 }
 0x1af   :  { %2808 = vmatprep.subr.bf16.mxu0 %v3193_v0  ;;  %2814 = vmatprep.subr.bf16.mxu1 %v3193_v0 }
 0x1b1   :  { %2593 = vmatmul.mubr.msk.f32.vlgmr.msra.gmra.mrb[8].mxu0 %vm497_vm2, %v808_v28  ;;  %2604 = vmatmul.mubr.msk.f32.vlgmr.msra.gmra.mrb[12].mxu1 %vm497_vm2, %v808_v28 }
 0x1b2   :  { %2810 = vmatpush3.bf16.msra.mxu0 %v3394_v14  ;;  %2816 = vmatpush3.bf16.msra.mxu1 %v3411_v25 }
 0x1b3   :  { %2811 = vmatprep.subr.bf16.mxu0 %v3193_v0  ;;  %2817 = vmatprep.subr.bf16.mxu1 %v3193_v0 }
 0x1b4   :  { %2614 = vmatprep.mubr.msk.f32.mxu0 %vm3194_vm0, %v3195_v1  ;;  %2625 = vmatprep.mubr.msk.f32.mxu1 %vm3194_vm0, %v3195_v1 }
 0x1b6   :  { %2813 = vmatpush3.bf16.msra.mxu0 %v3402_v20  ;;  %2819 = vmatpush3.bf16.msra.mxu1 %v3424_v32 }
 0x1b7   :  { %2820 = vmatprep.subr.bf16.mxu0 %v3193_v0  ;;  %2826 = vmatprep.subr.bf16.mxu1 %v3193_v0 }
 0x27c   :  { %v878_v29 = vpop.f32.mrb[6].mxu0  ;;  %v958_v30 = vpop.f32.mrb[10].mxu1 }
 0x27d   :  { %v883_v31 = vrot.slane %v878_v29, 6  ;;  %v963_v34 = vrot.slane %v958_v30, 6  ;;  %v2572_v35 = vpop.f32.mrb[7].mxu0  ;;  %v2583_v37 = vpop.f32.mrb[11].mxu1 }
 0x27f   :  { %v885_v38 = vadd.f32 %v883_v31, %v3464_v47  ;;  %v965_v40 = vadd.f32 %v963_v34, %v3467_v55 }
 0x281   :  { %v2344_v41 = vmul.f32 -1.442695, %v885_v38  ;;  %v2346_v42 = vmul.f32 -1.442695, %v965_v40 }
 0x283   :  { %2913 = vpow2.f32 %v2344_v41 }
 0x284   :  { %2915 = vpow2.f32 %v2346_v42  ;;  %v1038_v43 = vpop.f32.mrb[8].mxu0  ;;  %v1113_v44 = vpop.f32.mrb[12].mxu1 }
 0x285   :  { %v1118_v45 = vrot.slane %v1113_v44, 6  ;;  %v2594_v46 = vpop.f32.mrb[9].mxu0  ;;  %v2605_v48 = vpop.f32.mrb[13].mxu1  ;;  %v1043_v49 = vrot.slane %v1038_v43, 6 }
 0x287   :  { %v1120_v50 = vadd.f32 %v1118_v45, %v3473_v4  ;;  %v1045_v52 = vadd.f32 %v1043_v49, %v3470_v63 }
 0x289   :  { %v2349_v51 = vmul.f32 -1.442695, %v1120_v50 }
 0x28b   :  { %2917 = vpow2.f32 %v2349_v51 }
 0x28c   :  { %2919 = vtanh.f32 %v1045_v52  ;;  %v1793_v52 = vld [vmem:[%s3665_s7 + $0x18] sm:$0xff] }
 0x28d   :  { %v2914_v53 = vpop.eup %2913 }
 0x28e   :  { %v2916_v54 = vpop.eup %2915  ;;  %v889_v56 = vadd.f32 1.0, %v2914_v53 }
 0x28f   :  { %v969_v57 = vadd.f32 1.0, %v2916_v54  ;;  %v1789_v54 = vld [vmem:[#allocation7] sm:$0xff] }
 0x290   :  { %2921 = vrcp.f32 %v889_v56 }
 0x291   :  { %2923 = vrcp.f32 %v969_v57 }
 0x295   :  { %v2918_v58 = vpop.eup %2917 }
 0x296   :  { %v2920_v59 = vpop.eup %2919  ;;  %v1124_v3 = vadd.f32 1.0, %v2918_v58 }
 0x298   :  { %2925 = vrcp.f32 %v1124_v3 }
 0x29a   :  { %v2922_v60 = vpop.eup %2921 }
 0x29b   :  { %v2924_v62 = vpop.eup %2923  ;;  %v1131_v2 = vmul.f32 %v2922_v60, %v2920_v59 }
 0x29c   :  { %v1130_v5 = vmul.f32 %v2924_v62, %v1128_v61 }
 0x29e   :  { %v3512_v6 = vadd.f32 %v1131_v2, %v1130_v5 }
 0x2a0   :  { %2927 = vtanh.f32 %v3512_v6  ;;  %v1455_v41 = vrot.slane %v3512_v6, 6 }
 0x2a2   :  { %v2926_v7 = vpop.eup %2925 }
 0x2aa   :  { %v2928_v8 = vpop.eup %2927 }
 0x2ab   :  { %v1134_v9 = vmul.f32 %v2928_v8, %v2926_v7 }
 0x2ad   :  { %v1136_v10 = vrot.slane %v1134_v9, 2 }
 0x2af   :  { %2615 = vmatmul.mubr.msk.f32.vlgmr.msra.gmra.mrb[10].mxu0 %vm497_vm2, %v1136_v10  ;;  %2626 = vmatmul.mubr.msk.f32.vlgmr.msra.gmra.mrb[14].mxu1 %vm497_vm2, %v1136_v10 }
 0x2b0   :  { %2822 = vmatpush3.bf16.msra.mxu0 %v3418_v27  ;;  %2828 = vmatpush3.bf16.msra.mxu1 %v3436_v36 }
 0x2b1   :  { %2823 = vmatprep.subr.bf16.mxu0 %v3193_v0  ;;  %2829 = vmatprep.subr.bf16.mxu1 %v3193_v0 }
 0x2b2   :  { %2636 = vmatprep.mubr.msk.f32.mxu0 %vm3194_vm0, %v3195_v1  ;;  %2647 = vmatprep.mubr.msk.f32.mxu1 %vm3194_vm0, %v3195_v1 }
 0x2b4   :  { %2825 = vmatpush3.bf16.msra.mxu0 %v3428_v33  ;;  %2831 = vmatpush3.bf16.msra.mxu1 %v3444_v39 }
 0x2b5   :  { %2832 = vmatprep.subr.bf16.mxu0 %v3193_v0  ;;  %2838 = vmatprep.subr.bf16.mxu1 %v3193_v0 }
 0x2b7   :  { %2637 = vmatmul.mubr.msk.f32.vlgmr.msra.gmra.mrb[12].mxu0 %vm497_vm2, %v1136_v10  ;;  %2648 = vmatmul.mubr.msk.f32.vlgmr.msra.gmra.mrb[16].mxu1 %vm497_vm2, %v1136_v10 }
 0x2b8   :  { %2834 = vmatpush3.bf16.msra.mxu0 %v3394_v14  ;;  %2840 = vmatpush3.bf16.msra.mxu1 %v3411_v25 }
 0x2b9   :  { %2835 = vmatprep.subr.bf16.mxu0 %v3193_v0  ;;  %2841 = vmatprep.subr.bf16.mxu1 %v3193_v0 }
 0x2ba   :  { %2658 = vmatprep.mubr.msk.f32.mxu0 %vm3194_vm0, %v3195_v1  ;;  %2669 = vmatprep.mubr.msk.f32.mxu1 %vm3194_vm0, %v3195_v1 }
 0x2bc   :  { %2837 = vmatpush3.bf16.msra.mxu0 %v3402_v20  ;;  %2843 = vmatpush3.bf16.msra.mxu1 %v3424_v32 }
 0x2bd   :  { %2844 = vmatprep.subr.bf16.mxu0 %v3193_v0  ;;  %2850 = vmatprep.subr.bf16.mxu1 %v3193_v0 }
 0x382   :  { %v1205_v14 = vpop.f32.mrb[10].mxu0  ;;  %v1285_v25 = vpop.f32.mrb[14].mxu1 }
 0x383   :  { %v1210_v11 = vrot.slane %v1205_v14, 4  ;;  %v1290_v12 = vrot.slane %v1285_v25, 4  ;;  %v2616_v13 = vpop.f32.mrb[11].mxu0  ;;  %v2627_v15 = vpop.f32.mrb[15].mxu1 }
 0x385   :  { %v1212_v16 = vadd.f32 %v1210_v11, %v3464_v47  ;;  %v1292_v17 = vadd.f32 %v1290_v12, %v3467_v55 }
 0x387   :  { %v2351_v18 = vmul.f32 -1.442695, %v1212_v16  ;;  %v2353_v19 = vmul.f32 -1.442695, %v1292_v17 }
 0x389   :  { %2929 = vpow2.f32 %v2351_v18 }
 0x38a   :  { %2931 = vpow2.f32 %v2353_v19  ;;  %v1365_v20 = vpop.f32.mrb[12].mxu0  ;;  %v1440_v32 = vpop.f32.mrb[16].mxu1 }
 0x38b   :  { %v1445_v21 = vrot.slane %v1440_v32, 4  ;;  %v2638_v22 = vpop.f32.mrb[13].mxu0  ;;  %v2649_v23 = vpop.f32.mrb[17].mxu1  ;;  %v1370_v24 = vrot.slane %v1365_v20, 4 }
 0x38d   :  { %v1447_v26 = vadd.f32 %v1445_v21, %v3473_v4  ;;  %v1372_v29 = vadd.f32 %v1370_v24, %v3470_v63 }
 0x38f   :  { %v2356_v28 = vmul.f32 -1.442695, %v1447_v26 }
 0x391   :  { %2933 = vpow2.f32 %v2356_v28  ;;  %v2364_v28 = vld [vmem:[#allocation13] ss:$0 sm:$0xff] }
 0x392   :  { %2935 = vtanh.f32 %v1372_v29 }
 0x393   :  { %v2930_v30 = vpop.eup %2929 }
 0x394   :  { %v2932_v31 = vpop.eup %2931  ;;  %v1216_v34 = vadd.f32 1.0, %v2930_v30 }
 0x395   :  { %v1296_v35 = vadd.f32 1.0, %v2932_v31 }
 0x396   :  { %2937 = vrcp.f32 %v1216_v34 }
 0x397   :  { %2939 = vrcp.f32 %v1296_v35 }
 0x39b   :  { %v2934_v37 = vpop.eup %2933 }
 0x39c   :  { %v2936_v38 = vpop.eup %2935  ;;  %v1451_v44 = vadd.f32 1.0, %v2934_v37 }
 0x39e   :  { %2941 = vrcp.f32 %v1451_v44  ;;  %v2041_v44 = vld [vmem:[#allocation14] sm:$0xff] }
 0x3a0   :  { %v2938_v40 = vpop.eup %2937 }
 0x3a1   :  { %v2940_v42 = vpop.eup %2939  ;;  %v1458_v43 = vmul.f32 %v2938_v40, %v2936_v38 }
 0x3a2   :  { %v1457_v45 = vmul.f32 %v2940_v42, %v1455_v41 }
 0x3a4   :  { %v3548_v46 = vadd.f32 %v1458_v43, %v1457_v45  ;;  %v2042_v45 = vld [vmem:[#allocation14 + $0x8] sm:$0xff] }
 0x3a6   :  { %2943 = vtanh.f32 %v3548_v46  ;;  %v1782_v19 = vrot.slane %v3548_v46, 6  ;;  %v2043_v46 = vld [vmem:[#allocation14 + $0x10] sm:$0xff] }
 0x3a8   :  { %v2942_v48 = vpop.eup %2941 }
 0x3b0   :  { %v2944_v49 = vpop.eup %2943 }
 0x3b1   :  { %v1461_v50 = vmul.f32 %v2944_v49, %v2942_v48  ;;  %v2863_v48 = vpack.c.bf16 %v2042_v45, %v2041_v44  ;;  %v2044_v49 = vld [vmem:[#allocation14 + $0x18] sm:$0xff] }
 0x3b3   :  { %v1463_v51 = vrot.slane %v1461_v50, 4  ;;  %v2866_v50 = vpack.c.bf16 %v2044_v49, %v2043_v46 }
 0x3b5   :  { %2659 = vmatmul.mubr.msk.f32.vlgmr.msra.gmra.mrb[14].mxu0 %vm497_vm2, %v1463_v51  ;;  %2670 = vmatmul.mubr.msk.f32.vlgmr.msra.gmra.mrb[18].mxu1 %vm497_vm2, %v1463_v51 }
 0x3b6   :  { %2846 = vmatpush3.bf16.msra.mxu0 %v3418_v27  ;;  %2852 = vmatpush3.bf16.msra.mxu1 %v3436_v36  ;;  %v1790_v27 = vld [vmem:[%s3665_s7] sm:$0xff]  ;;  %v1792_v36 = vld [vmem:[%s3665_s7 + $0x10] sm:$0xff] }
 0x3b7   :  { %2847 = vmatprep.subr.bf16.mxu0 %v3193_v0  ;;  %2853 = vmatprep.subr.bf16.mxu1 %v3193_v0  ;;  %v2860_v53 = vpack.c.bf16 %v1793_v52, %v1792_v36 }
 0x3b8   :  { %2680 = vmatprep.mubr.msk.f32.mxu0 %vm3194_vm0, %v3195_v1  ;;  %2691 = vmatprep.mubr.msk.f32.mxu1 %vm3194_vm0, %v3195_v1 }
 0x3ba   :  { %2849 = vmatpush3.bf16.msra.mxu0 %v3428_v33  ;;  %2855 = vmatpush3.bf16.msra.mxu1 %v3444_v39  ;;  %v1791_v33 = vld [vmem:[%s3665_s7 + $0x8] sm:$0xff] }
 0x3bb   :  { %2856 = vmatprep.subr.bf16.mxu0 %v3193_v0  ;;  %2705 = vmatprep.subr.mxu1 %v3195_v1  ;;  %v2857_v39 = vpack.c.bf16 %v1791_v33, %v1790_v27  ;;  %v2037_v27 = vld [vmem:[%s3667_s9] sm:$0xff]  ;;  %v2038_v33 = vld [vmem:[%s3667_s9 + $0x8] sm:$0xff] }
 0x3bd   :  { %2681 = vmatmul.mubr.msk.f32.vlgmr.msra.gmra.mrb[16].mxu0 %vm497_vm2, %v1463_v51  ;;  %2692 = vmatmul.mubr.msk.f32.vlgmr.msra.gmra.mrb[20].mxu1 %vm497_vm2, %v1463_v51 }
 0x3be   :  { %2702 = vmatprep.mubr.msk.f32.mxu0 %vm3194_vm0, %v3195_v1  ;;  %2707 = vmatprep.mubr.msk.f32.mxu1 %vm3194_vm0, %v3195_v1 }
 0x3bf   :  { %2858 = vmatpush3.bf16.msra.mxu0 %v2857_v39  ;;  %v2869_v39 = vpack.c.bf16 %v2038_v33, %v2037_v27 }
 0x3c0   :  { %2859 = vmatprep.subr.bf16.mxu0 %v3193_v0 }
 0x3c3   :  { %2861 = vmatpush3.bf16.msra.mxu0 %v2860_v53  ;;  %2706 = vmatpush3.xpose.msk.msra.mxu1 %vm497_vm2, %v1789_v54  ;;  %v2039_v53 = vld [vmem:[%s3667_s9 + $0x10] sm:$0xff] }
 0x3c4   :  { %2862 = vmatprep.subr.bf16.mxu0 %v3193_v0  ;;  %2710 = vmatprep.subr.mxu1 %v3195_v1 }
 0x488   :  { %v1532_v56 = vpop.f32.mrb[14].mxu0  ;;  %v1612_v57 = vpop.f32.mrb[18].mxu1 }
 0x489   :  { %v1537_v58 = vrot.slane %v1532_v56, 2  ;;  %v1617_v59 = vrot.slane %v1612_v57, 2  ;;  %v2660_v60 = vpop.f32.mrb[15].mxu0  ;;  %v2671_v61 = vpop.f32.mrb[19].mxu1 }
 0x48a   :  { %v2197_v61 = vld [vmem:[%s3670_s12] sm:$0xff] }
 0x48b   :  { %v1539_v62 = vadd.f32 %v1537_v58, %v3464_v47  ;;  %v1619_v2 = vadd.f32 %v1617_v59, %v3467_v55 }
 0x48d   :  { %v2358_v3 = vmul.f32 -1.442695, %v1539_v62  ;;  %v2360_v5 = vmul.f32 -1.442695, %v1619_v2  ;;  %v2198_v62 = vld [vmem:[%s3670_s12 + $0x8] sm:$0xff]  ;;  %v2199_v2 = vld [vmem:[%s3670_s12 + $0x10] sm:$0xff] }
 0x48f   :  { %2945 = vpow2.f32 %v2358_v3  ;;  %v2875_v3 = vpack.c.bf16 %v2198_v62, %v2197_v61 }
 0x490   :  { %2947 = vpow2.f32 %v2360_v5  ;;  %v1692_v6 = vpop.f32.mrb[16].mxu0  ;;  %v1767_v7 = vpop.f32.mrb[20].mxu1  ;;  %v2200_v5 = vld [vmem:[%s3670_s12 + $0x18] sm:$0xff]  ;;  %s3197_s12 = smov [#allocation16]  }
 0x491   :  { %v1772_v8 = vrot.slane %v1767_v7, 2  ;;  %v2682_v9 = vpop.f32.mrb[17].mxu0  ;;  %v2693_v10 = vpop.f32.mrb[21].mxu1  ;;  %v1697_v14 = vrot.slane %v1692_v6, 2  ;;  %v2371_v7 = vld [vmem:[%s3669_s11] ss:$0 sm:$0xff] }
 0x492   :  { %s3196_s11 = smov 48  }
 0x493   :  { %v1774_v25 = vadd.f32 %v1772_v8, %v3473_v4  ;;  %v1699_v12 = vadd.f32 %v1697_v14, %v3470_v63 }
 0x495   :  { %v2363_v11 = vmul.f32 -1.442695, %v1774_v25  ;;  %v2372_v25 = vld [vmem:[%s3671_s13] ss:$0 sm:$0xff]  ;;  %s2315_s13 = sshll.u32 %s3197_s12, 4  ;;  %s2316_s13 = int_to_ptr.vmem [resolvable:$true] %s2315_s13 }
 0x496   :  { %s3147_s30 = scalar_lea.vmem %s2316_s13, 32  ;;  %p3152_p9 = scmp.lt.s32.totalorder %s2316_s13, %s2316_s13 }
 0x497   :  { %2949 = vpow2.f32 %v2363_v11  ;;  %p3148_p8 = scmp.ne.s32.totalorder %s2316_s13, %s3147_s30  ;;  %p3153_p10 = scmp.lt.s32.totalorder %s3147_s30, %s3147_s30 }
 0x498   :  { %2951 = vtanh.f32 %v1699_v12 }
 0x499   :  { %v2946_v13 = vpop.eup %2945  ;;  %p3154_p11 = por %p3153_p10, %p3152_p9 }
 0x49a   :  { %v2948_v15 = vpop.eup %2947  ;;  %v1543_v47 = vadd.f32 1.0, %v2946_v13 }
 0x49b   :  { %v1623_v55 = vadd.f32 1.0, %v2948_v15  ;;  %p3155_p12 = pnand %p3154_p11, %p3148_p8 }
 0x49c   :  { %2953 = vrcp.f32 %v1543_v47 }
 0x49d   :  { %2955 = vrcp.f32 %v1623_v55 }
 0x4a1   :  { %v2950_v16 = vpop.eup %2949 }
 0x4a2   :  { %v2952_v17 = vpop.eup %2951  ;;  %v1778_v21 = vadd.f32 1.0, %v2950_v16 }
 0x4a4   :  { %2957 = vrcp.f32 %v1778_v21 }
 0x4a6   :  { %v2954_v18 = vpop.eup %2953 }
 0x4a7   :  { %v2956_v20 = vpop.eup %2955  ;;  %v1785_v32 = vmul.f32 %v2954_v18, %v2952_v17 }
 0x4a8   :  { %v1784_v4 = vmul.f32 %v2956_v20, %v1782_v19 }
 0x4aa   :  { %v3592_v22 = vadd.f32 %v1785_v32, %v1784_v4 }
 0x4ac   :  { %2959 = vtanh.f32 %v3592_v22  ;;  %v2299_v18 = vrot.slane %v3592_v22, 6 }
 0x4ae   :  { %v2958_v63 = vpop.eup %2957 }
 0x4b6   :  { %v2960_v23 = vpop.eup %2959 }
 0x4b7   :  { %v1788_v24 = vmul.f32 %v2960_v23, %v2958_v63 }
 0x4b9   :  { %v1802_v26 = vrot.slane %v1788_v24, 6 }
 0x4bb   :  { %2703 = vmatmul.mubr.msk.f32.vlgmr.msra.gmra.mrb[18].mxu0 %vm497_vm2, %v1802_v26 }
 0x4bc   :  { %2723 = vmatprep.mubr.msk.f32.mxu0 %vm3194_vm0, %v3195_v1  ;;  %2864 = vmatpush3.bf16.msra.mxu0 %v2863_v48 }
 0x4bd   :  { %2865 = vmatprep.subr.bf16.mxu0 %v3193_v0 }
 0x4c0   :  { %2867 = vmatpush3.bf16.msra.mxu0 %v2866_v50 }
 0x4c1   :  { %2874 = vmatprep.subr.bf16.mxu0 %v3193_v0 }
 0x58e   :  { %v1871_v29 = vpop.f32.mrb[18].mxu0 }
 0x58f   :  { %v1872_v30 = vadd.f32 %v2364_v28, %v1871_v29  ;;  %v2704_v31 = vpop.f32.mrb[19].mxu0 }
 0x591   :  { %2708 = vmatmul.mubr.msk.f32.vlgmr.msra.gmra.mrb[22].mxu1 %vm497_vm2, %v1872_v30 }
 0x592   :  { %2711 = vmatpush3.msra.mxu1 %v1789_v54  ;;  %2712 = vmatprep.mubr.msk.f32.mxu1 %vm3194_vm0, %v3195_v1  ;;  %v2040_v54 = vld [vmem:[%s3667_s9 + $0x18] sm:$0xff] }
 0x593   :  { %2868 = vmatprep.subr.bf16.mxu1 %v3193_v0  ;;  %v2872_v56 = vpack.c.bf16 %v2040_v54, %v2039_v53 }
 0x664   :  { %v1947_v34 = vpop.f32.mrb[22].mxu1 }
 0x665   :  { %v2709_v35 = vpop.f32.mrb[23].mxu1  ;;  %v1952_v37 = vsel %vm1951_vm3, %v1947_v34, -inf }
 0x666   :  { %1953 = vmax.xlane.f32.xlu0 %v1952_v37 }
 0x6f3   :  { %v1954_v38 = vpop.xlane.xlu0 %1953 }
 0x6f4   :  { %v1955_v40 = vsub.f32 %v1947_v34, %v1954_v38 }
 0x6f6   :  { %v1956_v41 = vmul.f32 1.442695, %v1955_v40 }
 0x6f8   :  { %2961 = vpow2.f32 %v1956_v41 }
 0x702   :  { %v2962_v42 = vpop.eup %2961 }
 0x703   :  { %v1958_v43 = vsel %vm1951_vm3, %v2962_v42, 0.0 }
 0x704   :  { %1959 = vadd.xlane.f32.xlu0 %v1958_v43 }
 0x71a   :  { %2295 = vrot.lane.b32.xlu0 %v1802_v26, %s3186_s4 }
 0x791   :  { %v1960_v51 = vpop.xlane.xlu0 %1959 }
 0x792   :  { %2963 = vrcp.f32 %v1960_v51 }
 0x795   :  { %v2296_v63 = vpop.permute.xlu0 %2295 }
 0x79c   :  { %v2964_v36 = vpop.eup %2963 }
 0x79d   :  { %v1962_v52 = vmul.f32 %v2964_v36, %v2962_v42 }
 0x79f   :  { %2713 = vmatmul.mubr.msk.f32.vlgmr.msra.gmra.mrb[24].mxu1 %vm1963_vm4, %v1962_v52 }
 0x7a0   :  { %2870 = vmatpush3.bf16.msra.mxu1 %v2869_v39  ;;  %2734 = vmatprep.mubr.msk.f32.mxu1 %vm3194_vm0, %v3195_v1 }
 0x7a1   :  { %2871 = vmatprep.subr.bf16.mxu1 %v3193_v0 }
 0x7a4   :  { %2873 = vmatpush3.bf16.msra.mxu1 %v2872_v56 }
 0x7a7   :  { %2735 = vmatmul.mubr.msk.f32.vlgmr.msra.gmra.mrb[26].mxu1 %vm497_vm2, %v1802_v26 }
 0x872   :  { %v2033_v57 = vpop.f32.mrb[24].mxu1 }
 0x873   :  { %v2714_v58 = vpop.f32.mrb[25].mxu1  ;;  %2724 = vmatmul.mubr.msk.f32.vlgmr.msra.gmra.mrb[20].mxu0 %vm497_vm2, %v2033_v57 }
 0x874   :  { %2745 = vmatprep.mubr.msk.f32.mxu0 %vm3194_vm0, %v3195_v1  ;;  %2876 = vmatpush3.bf16.msra.mxu0 %v2875_v3  ;;  %v2878_v1 = vpack.c.bf16 %v2200_v5, %v2199_v2 }
 0x875   :  { %2877 = vmatprep.subr.bf16.mxu0 %v3193_v0 }
 0x878   :  { %2879 = vmatpush3.bf16.msra.mxu0 %v2878_v1 }
 0x87a   :  { %v2184_v59 = vpop.f32.mrb[26].mxu1 }
 0x87b   :  { %v2736_v60 = vpop.f32.mrb[27].mxu1 }
 0x946   :  { %v2114_v6 = vpop.f32.mrb[20].mxu0 }
 0x947   :  { %v2185_v8 = vadd.f32 %v2184_v59, %v2114_v6  ;;  %v2725_v9 = vpop.f32.mrb[21].mxu0 }
 0x949   :  { %v2195_v10 = vadd.f32 %v2371_v7, %v2185_v8 }
 0x94b   :  { %2965 = vtanh.f32 %v2195_v10 }
 0x955   :  { %v2966_v14 = vpop.eup %2965 }
 0x956   :  { %2746 = vmatmul.mubr.msk.f32.vlgmr.msra.gmra.mrb[22].mxu0 %vm497_vm2, %v2966_v14 }
 0xa29   :  { %v2277_v11 = vpop.f32.mrb[22].mxu0 }
 0xa2a   :  { %v2278_v0 = vadd.f32 %v2372_v25, %v2277_v11  ;;  %v2747_v12 = vpop.f32.mrb[23].mxu0 }
 0xa2c   :  { %v2282_v13 = vsel %vm2281_vm5, %v2278_v0, -inf }
 0xa2d   :  { %2283 = vmax.xlane.f32.xlu1 %v2282_v13 }
 0xaba   :  { %v2284_v15 = vpop.xlane.xlu1 %2283 }
 0xabb   :  { %v2285_v47 = vsub.f32 %v2278_v0, %v2284_v15 }
 0xabd   :  { %v2286_v55 = vmul.f32 1.442695, %v2285_v47 }
 0xabf   :  { %2967 = vpow2.f32 %v2286_v55 }
 0xac9   :  { %v2968_v16 = vpop.eup %2967 }
 0xaca   :  { %v2288_v17 = vsel %vm2281_vm5, %v2968_v16, 0.0 }
 0xacb   :  { %2289 = vadd.xlane.f32.xlu1 %v2288_v17 }
 0xadc   :  { %2300 = vrot.lane.b32.xlu1 %v2299_v18, %s3196_s11 }
 0xb58   :  { %v2290_v19 = vpop.xlane.xlu1 %2289 }
 0xb59   :  { %2969 = vlog2.f32 %v2290_v19 }
 0xb5c   :  { %v2301_v24 = vpop.permute.xlu1 %2300 }
 0xb63   :  { %v2970_v20 = vpop.eup %2969 }
 0xb64   :  { %v2292_v32 = vmul.f32 0.6931472, %v2970_v20 }
 0xb66   :  { %v2293_v21 = vadd.f32 %v2292_v32, %v2284_v15 }
 0xb68   :  { %v2294_v4 = vsub.f32 %v2278_v0, %v2293_v21 }
 0xb6a   :  { %v2303_v23 = vsel %vm161_vm1, %v2294_v4, %v2296_v63 }
 0xb6b   :  { %v2305_v26 = vsel %vm2304_vm6, %v2303_v23, %v2301_v24 }
 0xb6c   :  { %v2307_v28 = vsel %vm2306_vm7, %v2305_v26, 0.0 }
 0xb6d   :  { %2308 = vst [vmem:[#allocation16] sm:$0x3] %v2307_v28 }
 0xb6e   :  { %3158 = shalt.err (!%p3155_p12)
}
 0xb6f   :  { %s3159_s18 = scalar_lea.hbm %s3672_s14, 32 }
 0xb70   :  { %p3160_p13 = scmp.ne.s32.totalorder %s3672_s14, %s3159_s18  ;;  %p3163_p0 = scmp.lt.u32.totalorder %s3159_s18, %s3672_s14 }
 0xb72   :  { %p3165_p1 = pnand %p3163_p0, %p3160_p13 }
 0xb74   :  { %3168 = shalt.err (!%p3165_p1)
}
 0xb75   :  { %2318 = dma.vmem_to_hbm [thread:$0]  %s2316_s13, 32, %s3672_s14, [#allocation4]  }
 0xb76   :  { %3179 = dma.done.wait [#allocation4], 32  }
 0xb77   :  { %3180 = vsyncadd [#allocation4], 4294967264 }
 0xb78   :  { %2322 = vsyncpa [#allocation3], 1 }
 0xb79   :  { %2323 = vsyncpa [#allocation6], 1 }
 0xb7a   :  { %2324 = vsyncpa [#allocation9], 1 }
 0xb7b   :  { %2325 = vsyncpa [#allocation12], 1 }
 0xb7c   :  { %2326 = vsyncpa [#allocation15], 1 }
 0xb7d   :  { %2327 = vsyncpa [#allocation4], 1 }

</bundles_post_ra>
